<compile_context>
chip_gen: v7x
topology: tpu7x:2x2x1
jax: 0.10.0
libtpu: 0.0.40
codegen_flags: <defaults>
</compile_context>

<pallas_src>
import math

import jax
import jax.numpy as jnp
from jax.experimental import pallas as pl
from jax.experimental.pallas import tpu as pltpu

_LANE = 128


def _round_up(n, m):
    return ((n + m - 1) // m) * m


def mlp_kernel(x_ref, w1_ref, b1_ref, w2_ref, b2_ref, w3_ref, b3_ref,
               w4_ref, b4_ref, out_ref):
    # One (tm, D) batch tile through the whole 4-layer MLP.
    # Matmuls: bf16 operands on the MXU, f32 accumulation.
    # Bias + ReLU: f32 on the VPU.
    bf16 = jnp.bfloat16
    h = jnp.dot(x_ref[...].astype(bf16), w1_ref[...],
                preferred_element_type=jnp.float32)
    h = jnp.maximum(h + b1_ref[...], 0.0)
    h = jnp.dot(h.astype(bf16), w2_ref[...],
                preferred_element_type=jnp.float32)
    h = jnp.maximum(h + b2_ref[...], 0.0)
    h = jnp.dot(h.astype(bf16), w3_ref[...],
                preferred_element_type=jnp.float32)
    h = jnp.maximum(h + b3_ref[...], 0.0)
    h = jnp.dot(h.astype(bf16), w4_ref[...],
                preferred_element_type=jnp.float32)
    out_ref[...] = (h + b4_ref[...]).astype(out_ref.dtype)


def _pick_tm(batch, tm_max):
    """Batch-tile selection: full batch in one tile when small, otherwise
    >= 2 grid steps (v7x megacore) aligned to 128 rows, capped at tm_max."""
    b = max(batch, 1)
    if b <= 256:
        return _round_up(b, 8)
    return max(_LANE, min(tm_max, _round_up(pl.cdiv(b, 2), _LANE)))


def mlp_forward(x, params, *, tm_max=512):
    """x: (B, C, H, W) float32.  params: bf16 (in,out) weights (fc3/fc4 padded
    to 128 lanes), f32 (1,out) biases, plus params["out_features"]."""
    B = x.shape[0]
    x_flat = x.reshape(B, -1)                     # matches torch.flatten(x, 1)
    D = x_flat.shape[1]
    assert params["w1"].shape[0] == D, "input_size mismatch"

    out_size = params["out_features"]
    out_pad = params["w4"].shape[1]               # 128-lane padded output width

    tm = _pick_tm(B, tm_max)
    n_tiles = pl.cdiv(B, tm)                      # ragged last tile is fine

    def _resident(arr):
        # Same block index at every grid step -> stays resident in VMEM,
        # fetched once instead of per batch tile.
        return pl.BlockSpec(arr.shape, lambda i: (0, 0))

    out_padded = pl.pallas_call(
        mlp_kernel,
        out_shape=jax.ShapeDtypeStruct((B, out_pad), jnp.float32),
        grid=(n_tiles,),
        in_specs=[
            pl.BlockSpec((tm, D), lambda i: (i, 0)),   # x: tiled over batch
            _resident(params["w1"]), _resident(params["b1"]),
            _resident(params["w2"]), _resident(params["b2"]),
            _resident(params["w3"]), _resident(params["b3"]),
            _resident(params["w4"]), _resident(params["b4"]),
        ],
        out_specs=pl.BlockSpec((tm, out_pad), lambda i: (i, 0)),
        compiler_params=pltpu.CompilerParams(
            dimension_semantics=("parallel",)),
    )(x_flat,
      params["w1"], params["b1"], params["w2"], params["b2"],
      params["w3"], params["b3"], params["w4"], params["b4"])

    return out_padded[:, :out_size]


def init_params(key, in_features, output_size):
    """Deterministic init matching nn.Linear's uniform(-1/sqrt(fan_in), ...).
    Weights stored (in, out) so the kernel computes x @ W + b.  fc3/fc4 are
    zero-padded to 128 lanes here (once), weights are cast to bf16 for the MXU,
    biases stay f32."""
    dims = [(in_features, 512), (512, 128), (128, 32), (32, output_size)]
    params = {"out_features": output_size}
    for idx, (fan_in, fan_out) in enumerate(dims, start=1):
        key, kw, kb = jax.random.split(key, 3)
        bound = 1.0 / math.sqrt(fan_in)
        params[f"w{idx}"] = jax.random.uniform(
            kw, (fan_in, fan_out), jnp.float32, minval=-bound, maxval=bound)
        params[f"b{idx}"] = jax.random.uniform(
            kb, (1, fan_out), jnp.float32, minval=-bound, maxval=bound)

    # Lane-dense padding (exact zeros: padded h3 columns are relu(0)=0 and
    # their w4 rows are zero; padded fc4 columns are sliced off).
    h3 = params["w3"].shape[1]
    h3_pad = _round_up(h3, _LANE)
    o_pad = _round_up(output_size, _LANE)
    params["w3"] = jnp.pad(params["w3"], ((0, 0), (0, h3_pad - h3)))
    params["b3"] = jnp.pad(params["b3"], ((0, 0), (0, h3_pad - h3)))
    params["w4"] = jnp.pad(params["w4"],
                           ((0, h3_pad - h3), (0, o_pad - output_size)))
    params["b4"] = jnp.pad(params["b4"], ((0, 0), (0, o_pad - output_size)))

    for idx in range(1, 5):                       # bf16 weights for the MXU
        params[f"w{idx}"] = params[f"w{idx}"].astype(jnp.bfloat16)
    return params


if __name__ == "__main__":
    key = jax.random.PRNGKey(0)
    k_x, k_p = jax.random.split(key)

    B, C, H, W = 2, 4, 16, 16        # -> flattened D = 1024
    output_size = 10

    x = jax.random.normal(k_x, (B, C, H, W), jnp.float32)
    params = init_params(k_p, C * H * W, output_size)

    out = mlp_forward(x, params)
    out = jax.block_until_ready(out)

    # Reference mimicking the kernel numerics (bf16 MXU operands, f32 accum).
    xf = x.reshape(B, -1)
    bf16 = jnp.bfloat16
    h = jnp.dot(xf.astype(bf16), params["w1"], preferred_element_type=jnp.float32)
    h = jnp.maximum(h + params["b1"], 0.0)
    h = jnp.dot(h.astype(bf16), params["w2"], preferred_element_type=jnp.float32)
    h = jnp.maximum(h + params["b2"], 0.0)
    h = jnp.dot(h.astype(bf16), params["w3"], preferred_element_type=jnp.float32)
    h = jnp.maximum(h + params["b3"], 0.0)
    h = jnp.dot(h.astype(bf16), params["w4"], preferred_element_type=jnp.float32)
    ref = (h + params["b4"])[:, :output_size]

    assert out.shape == (B, output_size)
    assert jnp.allclose(out, ref, atol=1e-2, rtol=1e-2), \
        float(jnp.max(jnp.abs(out - ref)))

    print("KERNEL_OK")
</pallas_src>

<mosaic_0001>
module attributes {stable_mosaic.version = 11 : i64} {
  func.func @mlp_kernel(%arg0: i32, %arg1: memref<8x1024xf32, #tpu.memory_space<vmem>>, %arg2: memref<1024x512xbf16, #tpu.memory_space<vmem>>, %arg3: memref<1x512xf32, #tpu.memory_space<vmem>>, %arg4: memref<512x128xbf16, #tpu.memory_space<vmem>>, %arg5: memref<1x128xf32, #tpu.memory_space<vmem>>, %arg6: memref<128x128xbf16, #tpu.memory_space<vmem>>, %arg7: memref<1x128xf32, #tpu.memory_space<vmem>>, %arg8: memref<128x128xbf16, #tpu.memory_space<vmem>>, %arg9: memref<1x128xf32, #tpu.memory_space<vmem>>, %arg10: memref<8x128xf32, #tpu.memory_space<vmem>>) attributes {dimension_semantics = [#tpu.dimension_semantics<parallel>], iteration_bounds = array<i64: 1>, scalar_prefetch = 0 : i64, scratch_operands = 0 : i64, tpu.core_type = #tpu.core_type<tc>, window_params = [{transform_indices = @transform_0, window_bounds = array<i64: 8, 1024>}, {pipeline_mode = #tpu.pipeline_mode<synchronous>, transform_indices = @transform_1, window_bounds = array<i64: 1024, 512>}, {pipeline_mode = #tpu.pipeline_mode<synchronous>, transform_indices = @transform_2, window_bounds = array<i64: 1, 512>}, {pipeline_mode = #tpu.pipeline_mode<synchronous>, transform_indices = @transform_3, window_bounds = array<i64: 512, 128>}, {pipeline_mode = #tpu.pipeline_mode<synchronous>, transform_indices = @transform_4, window_bounds = array<i64: 1, 128>}, {pipeline_mode = #tpu.pipeline_mode<synchronous>, transform_indices = @transform_5, window_bounds = array<i64: 128, 128>}, {pipeline_mode = #tpu.pipeline_mode<synchronous>, transform_indices = @transform_6, window_bounds = array<i64: 1, 128>}, {pipeline_mode = #tpu.pipeline_mode<synchronous>, transform_indices = @transform_7, window_bounds = array<i64: 128, 128>}, {pipeline_mode = #tpu.pipeline_mode<synchronous>, transform_indices = @transform_8, window_bounds = array<i64: 1, 128>}, {transform_indices = @transform_9, window_bounds = array<i64: 8, 128>}]} {
    %c0 = arith.constant 0 : index
    %c0_0 = arith.constant 0 : index
    %0 = vector.load %arg1[%c0, %c0_0] : memref<8x1024xf32, #tpu.memory_space<vmem>>, vector<8x1024xf32>
    %1 = arith.truncf %0 : vector<8x1024xf32> to vector<8x1024xbf16>
    %c0_1 = arith.constant 0 : index
    %c0_2 = arith.constant 0 : index
    %2 = vector.load %arg2[%c0_1, %c0_2] : memref<1024x512xbf16, #tpu.memory_space<vmem>>, vector<1024x512xbf16>
    %cst = arith.constant dense<0.000000e+00> : vector<8x512xf32>
    %3 = tpu.matmul %1, %2, %cst {dimension_numbers = #tpu.dot_dimension_numbers<[1], [0], [0], [1], [0, 0, 1, 1], [], []>} : vector<8x1024xbf16>, vector<1024x512xbf16>, vector<8x512xf32> -> vector<8x512xf32>
    %c0_3 = arith.constant 0 : index
    %c0_4 = arith.constant 0 : index
    %4 = vector.load %arg3[%c0_3, %c0_4] : memref<1x512xf32, #tpu.memory_space<vmem>>, vector<1x512xf32>
    %5 = vector.broadcast %4 : vector<1x512xf32> to vector<8x512xf32>
    %6 = arith.addf %3, %5 : vector<8x512xf32>
    %cst_5 = arith.constant 0.000000e+00 : f32
    %7 = vector.broadcast %cst_5 : f32 to vector<8x512xf32>
    %8 = arith.maximumf %6, %7 : vector<8x512xf32>
    %9 = arith.truncf %8 : vector<8x512xf32> to vector<8x512xbf16>
    %c0_6 = arith.constant 0 : index
    %c0_7 = arith.constant 0 : index
    %10 = vector.load %arg4[%c0_6, %c0_7] : memref<512x128xbf16, #tpu.memory_space<vmem>>, vector<512x128xbf16>
    %cst_8 = arith.constant dense<0.000000e+00> : vector<8x128xf32>
    %11 = tpu.matmul %9, %10, %cst_8 {dimension_numbers = #tpu.dot_dimension_numbers<[1], [0], [0], [1], [0, 0, 1, 1], [], []>} : vector<8x512xbf16>, vector<512x128xbf16>, vector<8x128xf32> -> vector<8x128xf32>
    %c0_9 = arith.constant 0 : index
    %c0_10 = arith.constant 0 : index
    %12 = vector.load %arg5[%c0_9, %c0_10] : memref<1x128xf32, #tpu.memory_space<vmem>>, vector<1x128xf32>
    %13 = vector.broadcast %12 : vector<1x128xf32> to vector<8x128xf32>
    %14 = arith.addf %11, %13 : vector<8x128xf32>
    %cst_11 = arith.constant 0.000000e+00 : f32
    %15 = vector.broadcast %cst_11 : f32 to vector<8x128xf32>
    %16 = arith.maximumf %14, %15 : vector<8x128xf32>
    %17 = arith.truncf %16 : vector<8x128xf32> to vector<8x128xbf16>
    %c0_12 = arith.constant 0 : index
    %c0_13 = arith.constant 0 : index
    %18 = vector.load %arg6[%c0_12, %c0_13] : memref<128x128xbf16, #tpu.memory_space<vmem>>, vector<128x128xbf16>
    %cst_14 = arith.constant dense<0.000000e+00> : vector<8x128xf32>
    %19 = tpu.matmul %17, %18, %cst_14 {dimension_numbers = #tpu.dot_dimension_numbers<[1], [0], [0], [1], [0, 0, 1, 1], [], []>} : vector<8x128xbf16>, vector<128x128xbf16>, vector<8x128xf32> -> vector<8x128xf32>
    %c0_15 = arith.constant 0 : index
    %c0_16 = arith.constant 0 : index
    %20 = vector.load %arg7[%c0_15, %c0_16] : memref<1x128xf32, #tpu.memory_space<vmem>>, vector<1x128xf32>
    %21 = vector.broadcast %20 : vector<1x128xf32> to vector<8x128xf32>
    %22 = arith.addf %19, %21 : vector<8x128xf32>
    %cst_17 = arith.constant 0.000000e+00 : f32
    %23 = vector.broadcast %cst_17 : f32 to vector<8x128xf32>
    %24 = arith.maximumf %22, %23 : vector<8x128xf32>
    %25 = arith.truncf %24 : vector<8x128xf32> to vector<8x128xbf16>
    %c0_18 = arith.constant 0 : index
    %c0_19 = arith.constant 0 : index
    %26 = vector.load %arg8[%c0_18, %c0_19] : memref<128x128xbf16, #tpu.memory_space<vmem>>, vector<128x128xbf16>
    %cst_20 = arith.constant dense<0.000000e+00> : vector<8x128xf32>
    %27 = tpu.matmul %25, %26, %cst_20 {dimension_numbers = #tpu.dot_dimension_numbers<[1], [0], [0], [1], [0, 0, 1, 1], [], []>} : vector<8x128xbf16>, vector<128x128xbf16>, vector<8x128xf32> -> vector<8x128xf32>
    %c0_21 = arith.constant 0 : index
    %c0_22 = arith.constant 0 : index
    %28 = vector.load %arg9[%c0_21, %c0_22] : memref<1x128xf32, #tpu.memory_space<vmem>>, vector<1x128xf32>
    %29 = vector.broadcast %28 : vector<1x128xf32> to vector<8x128xf32>
    %30 = arith.addf %27, %29 : vector<8x128xf32>
    %c0_23 = arith.constant 0 : index
    %c0_24 = arith.constant 0 : index
    %31 = vector.load %arg10[%c0_23, %c0_24] : memref<8x128xf32, #tpu.memory_space<vmem>>, vector<8x128xf32>
    tpu.vector_store %arg10[%c0_23, %c0_24], %30 {strides = array<i32>} : memref<8x128xf32, #tpu.memory_space<vmem>>, vector<8x128xf32>,
    return
  }
  func.func @transform_0(%arg0: i32) -> (i32, i32) {
    %c0_i32 = arith.constant 0 : i32
    %c0_i32_0 = arith.constant 0 : i32
    return %arg0, %c0_i32 : i32, i32
  }
  func.func @transform_1(%arg0: i32) -> (i32, i32) {
    %c0_i32 = arith.constant 0 : i32
    %c0_i32_0 = arith.constant 0 : i32
    %c0_i32_1 = arith.constant 0 : i32
    return %c0_i32, %c0_i32_0 : i32, i32
  }
  func.func @transform_2(%arg0: i32) -> (i32, i32) {
    %c0_i32 = arith.constant 0 : i32
    %c0_i32_0 = arith.constant 0 : i32
    %c0_i32_1 = arith.constant 0 : i32
    return %c0_i32, %c0_i32_0 : i32, i32
  }
  func.func @transform_3(%arg0: i32) -> (i32, i32) {
    %c0_i32 = arith.constant 0 : i32
    %c0_i32_0 = arith.constant 0 : i32
    %c0_i32_1 = arith.constant 0 : i32
    return %c0_i32, %c0_i32_0 : i32, i32
  }
  func.func @transform_4(%arg0: i32) -> (i32, i32) {
    %c0_i32 = arith.constant 0 : i32
    %c0_i32_0 = arith.constant 0 : i32
    %c0_i32_1 = arith.constant 0 : i32
    return %c0_i32, %c0_i32_0 : i32, i32
  }
  func.func @transform_5(%arg0: i32) -> (i32, i32) {
    %c0_i32 = arith.constant 0 : i32
    %c0_i32_0 = arith.constant 0 : i32
    %c0_i32_1 = arith.constant 0 : i32
    return %c0_i32, %c0_i32_0 : i32, i32
  }
  func.func @transform_6(%arg0: i32) -> (i32, i32) {
    %c0_i32 = arith.constant 0 : i32
    %c0_i32_0 = arith.constant 0 : i32
    %c0_i32_1 = arith.constant 0 : i32
    return %c0_i32, %c0_i32_0 : i32, i32
  }
  func.func @transform_7(%arg0: i32) -> (i32, i32) {
    %c0_i32 = arith.constant 0 : i32
    %c0_i32_0 = arith.constant 0 : i32
    %c0_i32_1 = arith.constant 0 : i32
    return %c0_i32, %c0_i32_0 : i32, i32
  }
  func.func @transform_8(%arg0: i32) -> (i32, i32) {
    %c0_i32 = arith.constant 0 : i32
    %c0_i32_0 = arith.constant 0 : i32
    %c0_i32_1 = arith.constant 0 : i32
    return %c0_i32, %c0_i32_0 : i32, i32
  }
  func.func @transform_9(%arg0: i32) -> (i32, i32) {
    %c0_i32 = arith.constant 0 : i32
    %c0_i32_0 = arith.constant 0 : i32
    return %arg0, %c0_i32 : i32, i32
  }
}

</mosaic_0001>

<bundles_post_ra>
// kernel: tpu_custom_call.1
= control target key start
LH: loop header
LB: loop body
LE: loop exit
PB: predicated region body
PF: predicated region fallthrough
CT: control target
= control target key end

     0   :  { %14 = vsyncpa [#allocation3], 0  ;;  %s3948_s0 = inlined_call_operand.hbm [shape: f32[2,1024], index: 0, kind: input, shape index: {}]   ;;  %s3949_s1 = inlined_call_operand.hbm [shape: bf16[1024,512], index: 1, kind: input, shape index: {}]   ;;  %s3950_s2 = inlined_call_operand.vmem [shape: f32[1,512], index: 2, kind: input, shape index: {}]   ;;  %s3951_s3 = inlined_call_operand.hbm [shape: bf16[512,128], index: 3, kind: input, shape index: {}]   ;;  %s3952_s4 = inlined_call_operand.vmem [shape: f32[1,128], index: 4, kind: input, shape index: {}]   ;;  %s3953_s5 = inlined_call_operand.hbm [shape: bf16[128,128], index: 5, kind: input, shape index: {}]   ;;  %s3954_s6 = inlined_call_operand.vmem [shape: f32[1,128], index: 6, kind: input, shape index: {}]   ;;  %s3955_s7 = inlined_call_operand.hbm [shape: bf16[128,128], index: 7, kind: input, shape index: {}]   ;;  %s3956_s8 = inlined_call_operand.vmem [shape: f32[1,128], index: 8, kind: input, shape index: {}]   ;;  %s3957_s9 = inlined_call_operand.hbm [shape: f32[2,128], index: 9, kind: output, shape index: {}]  }
   0x1   :  { %15 = vsyncpa [#allocation6], 0 }
   0x2   :  { %16 = vsyncpa [#allocation9], 0 }
   0x3   :  { %17 = vsyncpa [#allocation4], 0 }
   0x4   :  { %22 = vsyncadd [#allocation3], 768  ;;  %s3725_s30 = smov [#allocation5]   ;;  %s3585_s13 = scalar_lea.hbm %s3949_s1, 32768 }
   0x5   :  { %s35_s10 = sshll.u32 %s3725_s30, 4  ;;  %p3586_p0 = scmp.ne.s32.totalorder %s3949_s1, %s3585_s13  ;;  %s36_s10 = int_to_ptr.vmem [resolvable:$true] %s35_s10 }
   0x6   :  { %p3589_p1 = scmp.lt.u32.totalorder %s3585_s13, %s3949_s1 }
   0x8   :  { %p3591_p2 = pnand %p3589_p1, %p3586_p0 }
   0xa   :  { %3594 = shalt.err (!%p3591_p2)
}
   0xb   :  { %s3595_s18 = scalar_lea.vmem %s36_s10, 32768  ;;  %p3600_p4 = scmp.lt.s32.totalorder %s36_s10, %s36_s10 }
   0xc   :  { %p3596_p3 = scmp.ne.s32.totalorder %s36_s10, %s3595_s18  ;;  %p3601_p5 = scmp.lt.s32.totalorder %s3595_s18, %s3595_s18 }
   0xe   :  { %p3602_p6 = por %p3601_p5, %p3600_p4 }
  0x10   :  { %p3603_p7 = pnand %p3602_p6, %p3596_p3 }
  0x12   :  { %3606 = shalt.err (!%p3603_p7)
}
  0x13   :  { %s3726_s19 = smov 256   ;;  %s3727_s20 = smov 16  }
  0x14   :  { %41 = dma.hbm_to_vmem [thread:$0]  %s3949_s1, 32768, %s36_s10, [#allocation6], %s3726_s19, %s3726_s19, %s3727_s20  }
  0x15   :  { %s3728_s23 = smov [#allocation8]   ;;  %s3729_s25 = smov [#allocation2]  }
  0x16   :  { %s63_s24 = sshll.u32 %s3728_s23, 4  ;;  %s23_s26 = sshll.u32 %s3729_s25, 4  ;;  %s64_s24 = int_to_ptr.vmem [resolvable:$true] %s63_s24  ;;  %s24_s26 = int_to_ptr.vmem [resolvable:$true] %s23_s26 }
  0x17   :  { %s3607_s29 = scalar_lea.hbm %s3953_s5, 1024 }
  0x18   :  { %p3608_p8 = scmp.ne.s32.totalorder %s3953_s5, %s3607_s29  ;;  %p3611_p9 = scmp.lt.u32.totalorder %s3607_s29, %s3953_s5 }
  0x1a   :  { %p3613_p10 = pnand %p3611_p9, %p3608_p8 }
  0x1c   :  { %3616 = shalt.err (!%p3613_p10)
}
  0x1d   :  { %s3617_s1 = scalar_lea.vmem %s64_s24, 1024  ;;  %p3622_p12 = scmp.lt.s32.totalorder %s64_s24, %s64_s24 }
  0x1e   :  { %p3618_p11 = scmp.ne.s32.totalorder %s64_s24, %s3617_s1  ;;  %p3623_p13 = scmp.lt.s32.totalorder %s3617_s1, %s3617_s1 }
  0x20   :  { %p3624_p0 = por %p3623_p13, %p3622_p12 }
  0x22   :  { %p3625_p1 = pnand %p3624_p0, %p3618_p11 }
  0x24   :  { %3628 = shalt.err (!%p3625_p1)
}
  0x25   :  { %s3730_s10 = smov 64   ;;  %s3731_s14 = smov 4  }
  0x26   :  { %69 = dma.hbm_to_vmem [thread:$0]  %s3953_s5, 1024, %s64_s24, [#allocation9], %s3730_s10, %s3730_s10, %s3731_s14  }
  0x27   :  { %s3629_s21 = scalar_lea.hbm %s3948_s0, 256 }
  0x28   :  { %p3630_p2 = scmp.ne.s32.totalorder %s3948_s0, %s3629_s21  ;;  %p3633_p3 = scmp.lt.u32.totalorder %s3629_s21, %s3948_s0 }
  0x2a   :  { %p3635_p4 = pnand %p3633_p3, %p3630_p2 }
  0x2c   :  { %3638 = shalt.err (!%p3635_p4)
}
  0x2d   :  { %s3639_s28 = scalar_lea.vmem %s24_s26, 256  ;;  %s3643_s29 = scalar_lea.vmem %s24_s26, 1024 }
  0x2e   :  { %p3640_p5 = scmp.ne.s32.totalorder %s24_s26, %s3639_s28  ;;  %p3644_p6 = scmp.lt.s32.totalorder %s24_s26, %s24_s26 }
  0x2f   :  { %p3645_p7 = scmp.lt.s32.totalorder %s3643_s29, %s3639_s28 }
  0x31   :  { %p3646_p8 = por %p3645_p7, %p3644_p6 }
  0x33   :  { %p3647_p9 = pnand %p3646_p8, %p3640_p5 }
  0x35   :  { %3650 = shalt.err (!%p3647_p9)
}
  0x36   :  { %29 = dma.hbm_to_vmem [thread:$0]  %s3948_s0, 256, %s24_s26, [#allocation3], %s3726_s19, %s3726_s19, %s3727_s20  }
  0x37   :  { %s3732_s30 = smov [#allocation7]   ;;  %s3733_s12 = smov [#allocation10]  }
  0x38   :  { %s49_s11 = sshll.u32 %s3732_s30, 4  ;;  %s77_s13 = sshll.u32 %s3733_s12, 4  ;;  %s50_s11 = int_to_ptr.vmem [resolvable:$true] %s49_s11  ;;  %s78_s13 = int_to_ptr.vmem [resolvable:$true] %s77_s13 }
  0x39   :  { %s3651_s16 = scalar_lea.hbm %s3951_s3, 4096 }
  0x3a   :  { %p3652_p10 = scmp.ne.s32.totalorder %s3951_s3, %s3651_s16  ;;  %p3655_p11 = scmp.lt.u32.totalorder %s3651_s16, %s3951_s3 }
  0x3c   :  { %p3657_p12 = pnand %p3655_p11, %p3652_p10 }
  0x3e   :  { %3660 = shalt.err (!%p3657_p12)
}
  0x3f   :  { %s3661_s0 = scalar_lea.vmem %s50_s11, 4096  ;;  %p3666_p0 = scmp.lt.s32.totalorder %s50_s11, %s50_s11 }
  0x40   :  { %p3662_p13 = scmp.ne.s32.totalorder %s50_s11, %s3661_s0  ;;  %p3667_p1 = scmp.lt.s32.totalorder %s3661_s0, %s3661_s0 }
  0x42   :  { %p3668_p2 = por %p3667_p1, %p3666_p0 }
  0x44   :  { %p3669_p3 = pnand %p3668_p2, %p3662_p13 }
  0x46   :  { %3672 = shalt.err (!%p3669_p3)
}
  0x47   :  { %55 = dma.hbm_to_vmem [thread:$0]  %s3951_s3, 4096, %s50_s11, [#allocation6], %s3730_s10, %s3730_s10, %s3731_s14  }
  0x48   :  { %s3673_s25 = scalar_lea.hbm %s3955_s7, 1024 }
  0x49   :  { %p3674_p4 = scmp.ne.s32.totalorder %s3955_s7, %s3673_s25  ;;  %p3677_p5 = scmp.lt.u32.totalorder %s3673_s25, %s3955_s7 }
  0x4b   :  { %p3679_p6 = pnand %p3677_p5, %p3674_p4 }
  0x4d   :  { %3682 = shalt.err (!%p3679_p6)
}
  0x4e   :  { %s3683_s24 = scalar_lea.vmem %s78_s13, 1024  ;;  %p3688_p8 = scmp.lt.s32.totalorder %s78_s13, %s78_s13 }
  0x4f   :  { %p3684_p7 = scmp.ne.s32.totalorder %s78_s13, %s3683_s24  ;;  %p3689_p9 = scmp.lt.s32.totalorder %s3683_s24, %s3683_s24 }
  0x51   :  { %p3690_p10 = por %p3689_p9, %p3688_p8 }
  0x53   :  { %p3691_p11 = pnand %p3690_p10, %p3684_p7 }
  0x55   :  { %3694 = shalt.err (!%p3691_p11)
}
  0x56   :  { %83 = dma.hbm_to_vmem [thread:$0]  %s3955_s7, 1024, %s78_s13, [#allocation9], %s3730_s10, %s3730_s10, %s3731_s14  }
  0x57   :  { %3717 = dma.done.wait [#allocation3], 1024  }
  0x58   :  { %3718 = vsyncadd [#allocation3], 4294966272 }
  0x59   :  { %3719 = dma.done.wait [#allocation6], 36864  }
  0x5a   :  { %3720 = vsyncadd [#allocation6], 4294930432 }
  0x5b   :  { %3721 = dma.done.wait [#allocation9], 2048  }
  0x5c   :  { %3722 = vsyncadd [#allocation9], 4294965248  ;;  %v3141_v0 = vld [vmem:[#allocation5 + $0x4] ss:$16 sps:$4 sm:$0xff]   ;;  %v3143_v1 = vld [vmem:[#allocation5 + $0xc] ss:$16 sps:$4 sm:$0xff]   ;;  %v125_v40 = vlaneseq }
  0x5d   :  { %1764 = vmatprep.subr.bf16.mxu0 %v3141_v0  ;;  %v3145_v2 = vld [vmem:[#allocation5] ss:$16 sps:$4 sm:$0xff]   ;;  %v3146_v3 = vld [vmem:[#allocation5 + $0x8] ss:$16 sps:$4 sm:$0xff]   ;;  %1928 = vmatprep.subr.bf16.mxu1 %v3143_v1  ;;  %v3147_v4 = vld [vmem:[#allocation5 + $0x24] ss:$16 sps:$4 sm:$0xff]  }
  0x5e   :  { %1765 = vmatpush1.bf16.msra.mxu0 %v3145_v2  ;;  %1929 = vmatpush1.bf16.msra.mxu1 %v3146_v3  ;;  %v3149_v5 = vld [vmem:[#allocation5 + $0x2c] ss:$16 sps:$4 sm:$0xff]   ;;  %v3151_v6 = vld [vmem:[#allocation5 + $0x20] ss:$16 sps:$4 sm:$0xff]   ;;  %v3152_v7 = vld [vmem:[#allocation5 + $0x28] ss:$16 sps:$4 sm:$0xff]  }
  0x5f   :  { %1766 = vmatprep.subr.bf16.mxu0 %v3147_v4  ;;  %1930 = vmatprep.subr.bf16.mxu1 %v3149_v5  ;;  %v3153_v8 = vld [vmem:[#allocation5 + $0x44] ss:$16 sps:$4 sm:$0xff]   ;;  %v3155_v9 = vld [vmem:[#allocation5 + $0x4c] ss:$16 sps:$4 sm:$0xff]   ;;  %v3157_v10 = vld [vmem:[#allocation5 + $0x40] ss:$16 sps:$4 sm:$0xff]  }
  0x60   :  { %v3158_v11 = vld [vmem:[#allocation5 + $0x48] ss:$16 sps:$4 sm:$0xff]   ;;  %v3159_v12 = vld [vmem:[#allocation5 + $0x64] ss:$16 sps:$4 sm:$0xff]   ;;  %v3161_v13 = vld [vmem:[#allocation5 + $0x6c] ss:$16 sps:$4 sm:$0xff]  }
  0x61   :  { %v3163_v14 = vld [vmem:[#allocation5 + $0x60] ss:$16 sps:$4 sm:$0xff]   ;;  %v3164_v15 = vld [vmem:[#allocation5 + $0x68] ss:$16 sps:$4 sm:$0xff]   ;;  %v3165_v16 = vld [vmem:[#allocation5 + $0x84] ss:$16 sps:$4 sm:$0xff]  }
  0x62   :  { %1767 = vmatpush1.bf16.msra.mxu0 %v3151_v6  ;;  %1931 = vmatpush1.bf16.msra.mxu1 %v3152_v7  ;;  %v3167_v17 = vld [vmem:[#allocation5 + $0x8c] ss:$16 sps:$4 sm:$0xff]   ;;  %v3169_v18 = vld [vmem:[#allocation5 + $0x80] ss:$16 sps:$4 sm:$0xff]   ;;  %v3170_v19 = vld [vmem:[#allocation5 + $0x88] ss:$16 sps:$4 sm:$0xff]  }
  0x63   :  { %1768 = vmatprep.subr.bf16.mxu0 %v3153_v8  ;;  %1932 = vmatprep.subr.bf16.mxu1 %v3155_v9  ;;  %v3171_v20 = vld [vmem:[#allocation5 + $0xa4] ss:$16 sps:$4 sm:$0xff]   ;;  %v3173_v21 = vld [vmem:[#allocation5 + $0xac] ss:$16 sps:$4 sm:$0xff]   ;;  %v3175_v22 = vld [vmem:[#allocation5 + $0xa0] ss:$16 sps:$4 sm:$0xff]  }
  0x64   :  { %v3176_v23 = vld [vmem:[#allocation5 + $0xa8] ss:$16 sps:$4 sm:$0xff]   ;;  %v3177_v24 = vld [vmem:[#allocation5 + $0xc4] ss:$16 sps:$4 sm:$0xff]   ;;  %v3179_v25 = vld [vmem:[#allocation5 + $0xcc] ss:$16 sps:$4 sm:$0xff]  }
  0x65   :  { %v3181_v26 = vld [vmem:[#allocation5 + $0xc0] ss:$16 sps:$4 sm:$0xff]   ;;  %v3182_v27 = vld [vmem:[#allocation5 + $0xc8] ss:$16 sps:$4 sm:$0xff]   ;;  %v3183_v28 = vld [vmem:[#allocation5 + $0xe4] ss:$16 sps:$4 sm:$0xff]  }
  0x66   :  { %1769 = vmatpush1.bf16.msra.mxu0 %v3157_v10  ;;  %1933 = vmatpush1.bf16.msra.mxu1 %v3158_v11  ;;  %v3185_v29 = vld [vmem:[#allocation5 + $0xec] ss:$16 sps:$4 sm:$0xff]   ;;  %v3187_v30 = vld [vmem:[#allocation5 + $0xe0] ss:$16 sps:$4 sm:$0xff]   ;;  %v3188_v31 = vld [vmem:[#allocation5 + $0xe8] ss:$16 sps:$4 sm:$0xff]  }
  0x67   :  { %1770 = vmatprep.subr.bf16.mxu0 %v3159_v12  ;;  %1934 = vmatprep.subr.bf16.mxu1 %v3161_v13  ;;  %v3189_v32 = vld [vmem:[#allocation5 + $0x104] ss:$16 sps:$4 sm:$0xff]   ;;  %v3191_v33 = vld [vmem:[#allocation5 + $0x10c] ss:$16 sps:$4 sm:$0xff]   ;;  %v3193_v34 = vld [vmem:[#allocation5 + $0x100] ss:$16 sps:$4 sm:$0xff]  }
  0x68   :  { %v3194_v35 = vld [vmem:[#allocation5 + $0x108] ss:$16 sps:$4 sm:$0xff]   ;;  %v3195_v36 = vld [vmem:[#allocation5 + $0x124] ss:$16 sps:$4 sm:$0xff]   ;;  %v3197_v37 = vld [vmem:[#allocation5 + $0x12c] ss:$16 sps:$4 sm:$0xff]  }
  0x69   :  { %v3734_v38 = vmov 1983009808   ;;  %v3199_v41 = vld [vmem:[#allocation5 + $0x120] ss:$16 sps:$4 sm:$0xff]   ;;  %v3200_v42 = vld [vmem:[#allocation5 + $0x128] ss:$16 sps:$4 sm:$0xff]  }
  0x6a   :  { %1771 = vmatpush1.bf16.msra.mxu0 %v3163_v14  ;;  %1935 = vmatpush1.bf16.msra.mxu1 %v3164_v15  ;;  %v123_v39 = vunpack.c.l.s4 %v3734_v38  ;;  %v3201_v43 = vld [vmem:[#allocation5 + $0x144] ss:$16 sps:$4 sm:$0xff]   ;;  %v3203_v44 = vld [vmem:[#allocation5 + $0x14c] ss:$16 sps:$4 sm:$0xff]   ;;  %v3865_v46 = vshrl.u32 %v125_v40, 7  ;;  %vm3736_vm0 = vmmov 0  }
  0x6b   :  { %1772 = vmatprep.subr.bf16.mxu0 %v3165_v16  ;;  %1936 = vmatprep.subr.bf16.mxu1 %v3167_v17  ;;  %v3205_v47 = vld [vmem:[#allocation5 + $0x140] ss:$16 sps:$4 sm:$0xff]   ;;  %v3206_v48 = vld [vmem:[#allocation5 + $0x148] ss:$16 sps:$4 sm:$0xff]   ;;  %v3207_v49 = vld [vmem:[#allocation5 + $0x164] ss:$16 sps:$4 sm:$0xff]  }
  0x6c   :  { %v124_v45 = vunpack.c.0.s8 %v123_v39  ;;  %v3209_v50 = vld [vmem:[#allocation5 + $0x16c] ss:$16 sps:$4 sm:$0xff]   ;;  %v3211_v51 = vld [vmem:[#allocation5 + $0x160] ss:$16 sps:$4 sm:$0xff]   ;;  %v3212_v52 = vld [vmem:[#allocation5 + $0x168] ss:$16 sps:$4 sm:$0xff]  }
  0x6d   :  { %v3213_v54 = vld [vmem:[#allocation5 + $0x184] ss:$16 sps:$4 sm:$0xff]   ;;  %v3237_v55 = vld [vmem:[#allocation2] ss:$16 sps:$4 sm:$0xff]   ;;  %v3215_v57 = vld [vmem:[#allocation5 + $0x18c] ss:$16 sps:$4 sm:$0xff]  }
  0x6e   :  { %1773 = vmatpush1.bf16.msra.mxu0 %v3169_v18  ;;  %1937 = vmatpush1.bf16.msra.mxu1 %v3170_v19  ;;  %v3868_v53 = vsub.s32 %v124_v45, %v3865_v46  ;;  %v3240_v56 = vld [vmem:[#allocation2 + $0x20] ss:$16 sps:$4 sm:$0xff]   ;;  %v3218_v61 = vld [vmem:[#allocation5 + $0x188] ss:$16 sps:$4 sm:$0xff]   ;;  %v3219_v62 = vld [vmem:[#allocation5 + $0x1a4] ss:$16 sps:$4 sm:$0xff]  }
  0x6f   :  { %1774 = vmatprep.subr.bf16.mxu0 %v3171_v20  ;;  %1938 = vmatprep.subr.bf16.mxu1 %v3173_v21  ;;  %v3217_v60 = vld [vmem:[#allocation5 + $0x180] ss:$16 sps:$4 sm:$0xff]   ;;  %v3221_v0 = vld [vmem:[#allocation5 + $0x1ac] ss:$16 sps:$4 sm:$0xff]   ;;  %v3224_v3 = vld [vmem:[#allocation5 + $0x1a8] ss:$16 sps:$4 sm:$0xff]  }
  0x70   :  { %v128_v58 = vrot.slane %v3237_v55, %v3868_v53  ;;  %v142_v59 = vrot.slane %v3240_v56, %v3868_v53  ;;  %v3223_v2 = vld [vmem:[#allocation5 + $0x1a0] ss:$16 sps:$4 sm:$0xff]   ;;  %v3225_v4 = vld [vmem:[#allocation5 + $0x1c4] ss:$16 sps:$4 sm:$0xff]   ;;  %v3227_v5 = vld [vmem:[#allocation5 + $0x1cc] ss:$16 sps:$4 sm:$0xff]  }
  0x71   :  { %v3239_v6 = vld [vmem:[#allocation2 + $0x4] ss:$16 sps:$4 sm:$0xff]   ;;  %v3229_v8 = vld [vmem:[#allocation5 + $0x1c0] ss:$16 sps:$4 sm:$0xff]   ;;  %v3230_v9 = vld [vmem:[#allocation5 + $0x1c8] ss:$16 sps:$4 sm:$0xff]  }
  0x72   :  { %1775 = vmatpush1.bf16.msra.mxu0 %v3175_v22  ;;  %1939 = vmatpush1.bf16.msra.mxu1 %v3176_v23  ;;  %v151_v63 = vcombine.high %v128_v58, %v142_v59  ;;  %v3242_v7 = vld [vmem:[#allocation2 + $0x24] ss:$16 sps:$4 sm:$0xff]   ;;  %v3233_v11 = vld [vmem:[#allocation5 + $0x1ec] ss:$16 sps:$4 sm:$0xff]   ;;  %v3873_v12 = vrot.slane %v3239_v6, %v3868_v53  ;;  %v3235_v14 = vld [vmem:[#allocation5 + $0x1e0] ss:$16 sps:$4 sm:$0xff]   ;;  %v150_v16 = vcombine.low %v128_v58, %v142_v59 }
  0x73   :  { %1776 = vmatprep.subr.bf16.mxu0 %v3177_v24  ;;  %1940 = vmatprep.subr.bf16.mxu1 %v3179_v25  ;;  %v3231_v10 = vld [vmem:[#allocation5 + $0x1e4] ss:$16 sps:$4 sm:$0xff]   ;;  %v3876_v13 = vrot.slane %v3242_v7, %v3868_v53  ;;  %v3236_v15 = vld [vmem:[#allocation5 + $0x1e8] ss:$16 sps:$4 sm:$0xff]   ;;  %v3248_v18 = vld [vmem:[#allocation5 + $0x20c] ss:$16 sps:$4 sm:$0xff]  }
  0x74   :  { %v199_v1 = vpack.c.bf16 %v151_v63, %v151_v63  ;;  %v3245_v17 = vld [vmem:[#allocation5 + $0x204] ss:$16 sps:$4 sm:$0xff]   ;;  %v3243_v20 = vld [vmem:[#allocation5 + $0x200] ss:$16 sps:$4 sm:$0xff]   ;;  %v3246_v21 = vld [vmem:[#allocation5 + $0x208] ss:$16 sps:$4 sm:$0xff]   ;;  %v198_v22 = vpack.c.bf16 %v150_v16, %v150_v16 }
  0x75   :  { %v153_v19 = vcombine.high %v3873_v12, %v3876_v13  ;;  %v3251_v23 = vld [vmem:[#allocation5 + $0x224] ss:$16 sps:$4 sm:$0xff]   ;;  %v3254_v24 = vld [vmem:[#allocation5 + $0x22c] ss:$16 sps:$4 sm:$0xff]   ;;  %v3267_v38 = vld [vmem:[#allocation5 + $0x280] ss:$16 sps:$4 sm:$0xff]  }
  0x76   :  { %1777 = vmatpush1.bf16.msra.mxu0 %v3181_v26  ;;  %1941 = vmatpush1.bf16.msra.mxu1 %v3182_v27  ;;  %v3249_v26 = vld [vmem:[#allocation5 + $0x220] ss:$16 sps:$4 sm:$0xff]   ;;  %v3252_v27 = vld [vmem:[#allocation5 + $0x228] ss:$16 sps:$4 sm:$0xff]   ;;  %v3275_v40 = vld [vmem:[#allocation5 + $0x2a4] ss:$16 sps:$4 sm:$0xff]  }
  0x77   :  { %1778 = vmatprep.subr.bf16.mxu0 %v3183_v28  ;;  %1942 = vmatprep.subr.bf16.mxu1 %v3185_v29  ;;  %v201_v25 = vpack.c.bf16 %v153_v19, %v153_v19  ;;  %v3257_v28 = vld [vmem:[#allocation5 + $0x244] ss:$16 sps:$4 sm:$0xff]   ;;  %v3260_v29 = vld [vmem:[#allocation5 + $0x24c] ss:$16 sps:$4 sm:$0xff]   ;;  %v3270_v39 = vld [vmem:[#allocation5 + $0x288] ss:$16 sps:$4 sm:$0xff]  }
  0x78   :  { %1796 = vmatprep.mubr.bf16.mxu0 %v199_v1  ;;  %1960 = vmatprep.mubr.bf16.mxu1 %v199_v1  ;;  %v3284_v45 = vld [vmem:[#allocation5 + $0x2cc] ss:$16 sps:$4 sm:$0xff]   ;;  %v3291_v56 = vld [vmem:[#allocation5 + $0x300] ss:$16 sps:$4 sm:$0xff]   ;;  %v3299_v58 = vld [vmem:[#allocation5 + $0x324] ss:$16 sps:$4 sm:$0xff]  }
  0x79   :  { %v3296_v55 = vld [vmem:[#allocation5 + $0x30c] ss:$16 sps:$4 sm:$0xff]   ;;  %v3306_v1 = vld [vmem:[#allocation5 + $0x348] ss:$16 sps:$4 sm:$0xff]   ;;  %v3317_v6 = vld [vmem:[#allocation5 + $0x384] ss:$16 sps:$4 sm:$0xff]  }
  0x7a   :  { %1779 = vmatpush1.bf16.msra.mxu0 %v3187_v30  ;;  %1943 = vmatpush1.bf16.msra.mxu1 %v3188_v31  ;;  %v3255_v30 = vld [vmem:[#allocation5 + $0x240] ss:$16 sps:$4 sm:$0xff]   ;;  %v3258_v31 = vld [vmem:[#allocation5 + $0x248] ss:$16 sps:$4 sm:$0xff]   ;;  %v3302_v59 = vld [vmem:[#allocation5 + $0x32c] ss:$16 sps:$4 sm:$0xff]  }
  0x7b   :  { %1780 = vmatprep.subr.bf16.mxu0 %v3189_v32  ;;  %1944 = vmatprep.subr.bf16.mxu1 %v3191_v33  ;;  %v3263_v32 = vld [vmem:[#allocation5 + $0x264] ss:$16 sps:$4 sm:$0xff]   ;;  %v3266_v33 = vld [vmem:[#allocation5 + $0x26c] ss:$16 sps:$4 sm:$0xff]   ;;  %v3330_v19 = vld [vmem:[#allocation5 + $0x3c8] ss:$16 sps:$4 sm:$0xff]  }
  0x7c   :  { %v3308_v63 = vld [vmem:[#allocation5 + $0x34c] ss:$16 sps:$4 sm:$0xff]   ;;  %v3329_v16 = vld [vmem:[#allocation5 + $0x3c4] ss:$16 sps:$4 sm:$0xff]  }
  0x7d   :  { %v3320_v7 = vld [vmem:[#allocation5 + $0x38c] ss:$16 sps:$4 sm:$0xff]  }
  0x7e   :  { %1781 = vmatpush1.bf16.msra.mxu0 %v3193_v34  ;;  %1945 = vmatpush1.bf16.msra.mxu1 %v3194_v35  ;;  %v3261_v34 = vld [vmem:[#allocation5 + $0x260] ss:$16 sps:$4 sm:$0xff]   ;;  %v3264_v35 = vld [vmem:[#allocation5 + $0x268] ss:$16 sps:$4 sm:$0xff]  }
  0x7f   :  { %1782 = vmatprep.subr.bf16.mxu0 %v3195_v36  ;;  %1946 = vmatprep.subr.bf16.mxu1 %v3197_v37  ;;  %v3269_v36 = vld [vmem:[#allocation5 + $0x284] ss:$16 sps:$4 sm:$0xff]   ;;  %v3272_v37 = vld [vmem:[#allocation5 + $0x28c] ss:$16 sps:$4 sm:$0xff]  }
  0x82   :  { %1783 = vmatpush1.bf16.msra.mxu0 %v3199_v41  ;;  %1947 = vmatpush1.bf16.msra.mxu1 %v3200_v42  ;;  %v3278_v41 = vld [vmem:[#allocation5 + $0x2ac] ss:$16 sps:$4 sm:$0xff]   ;;  %v3273_v42 = vld [vmem:[#allocation5 + $0x2a0] ss:$16 sps:$4 sm:$0xff]  }
  0x83   :  { %1784 = vmatprep.subr.bf16.mxu0 %v3201_v43  ;;  %1948 = vmatprep.subr.bf16.mxu1 %v3203_v44  ;;  %v3276_v43 = vld [vmem:[#allocation5 + $0x2a8] ss:$16 sps:$4 sm:$0xff]   ;;  %v3281_v44 = vld [vmem:[#allocation5 + $0x2c4] ss:$16 sps:$4 sm:$0xff]  }
  0x86   :  { %1785 = vmatpush1.bf16.msra.mxu0 %v3205_v47  ;;  %1949 = vmatpush1.bf16.msra.mxu1 %v3206_v48  ;;  %v3279_v47 = vld [vmem:[#allocation5 + $0x2c0] ss:$16 sps:$4 sm:$0xff]   ;;  %v3282_v48 = vld [vmem:[#allocation5 + $0x2c8] ss:$16 sps:$4 sm:$0xff]  }
  0x87   :  { %1786 = vmatprep.subr.bf16.mxu0 %v3207_v49  ;;  %1950 = vmatprep.subr.bf16.mxu1 %v3209_v50  ;;  %v3287_v49 = vld [vmem:[#allocation5 + $0x2e4] ss:$16 sps:$4 sm:$0xff]   ;;  %v3290_v50 = vld [vmem:[#allocation5 + $0x2ec] ss:$16 sps:$4 sm:$0xff]  }
  0x8a   :  { %1787 = vmatpush1.bf16.msra.mxu0 %v3211_v51  ;;  %1951 = vmatpush1.bf16.msra.mxu1 %v3212_v52  ;;  %v3285_v51 = vld [vmem:[#allocation5 + $0x2e0] ss:$16 sps:$4 sm:$0xff]   ;;  %v3288_v52 = vld [vmem:[#allocation5 + $0x2e8] ss:$16 sps:$4 sm:$0xff]  }
  0x8b   :  { %1788 = vmatprep.subr.bf16.mxu0 %v3213_v54  ;;  %1952 = vmatprep.subr.bf16.mxu1 %v3215_v57  ;;  %v3293_v54 = vld [vmem:[#allocation5 + $0x304] ss:$16 sps:$4 sm:$0xff]   ;;  %v3294_v57 = vld [vmem:[#allocation5 + $0x308] ss:$16 sps:$4 sm:$0xff]  }
  0x8e   :  { %1789 = vmatpush1.bf16.msra.mxu0 %v3217_v60  ;;  %1953 = vmatpush1.bf16.msra.mxu1 %v3218_v61  ;;  %v3297_v60 = vld [vmem:[#allocation5 + $0x320] ss:$16 sps:$4 sm:$0xff]   ;;  %v3300_v61 = vld [vmem:[#allocation5 + $0x328] ss:$16 sps:$4 sm:$0xff]  }
  0x8f   :  { %1790 = vmatprep.subr.bf16.mxu0 %v3219_v62  ;;  %1954 = vmatprep.subr.bf16.mxu1 %v3221_v0  ;;  %v3305_v62 = vld [vmem:[#allocation5 + $0x344] ss:$16 sps:$4 sm:$0xff]   ;;  %v3303_v0 = vld [vmem:[#allocation5 + $0x340] ss:$16 sps:$4 sm:$0xff]  }
  0x92   :  { %1791 = vmatpush1.bf16.msra.mxu0 %v3223_v2  ;;  %1955 = vmatpush1.bf16.msra.mxu1 %v3224_v3  ;;  %v3311_v2 = vld [vmem:[#allocation5 + $0x364] ss:$16 sps:$4 sm:$0xff]   ;;  %v3314_v3 = vld [vmem:[#allocation5 + $0x36c] ss:$16 sps:$4 sm:$0xff]  }
  0x93   :  { %1792 = vmatprep.subr.bf16.mxu0 %v3225_v4  ;;  %1956 = vmatprep.subr.bf16.mxu1 %v3227_v5  ;;  %v3309_v4 = vld [vmem:[#allocation5 + $0x360] ss:$16 sps:$4 sm:$0xff]   ;;  %v3312_v5 = vld [vmem:[#allocation5 + $0x368] ss:$16 sps:$4 sm:$0xff]  }
  0x96   :  { %1793 = vmatpush1.bf16.msra.mxu0 %v3229_v8  ;;  %1957 = vmatpush1.bf16.msra.mxu1 %v3230_v9  ;;  %v3315_v8 = vld [vmem:[#allocation5 + $0x380] ss:$16 sps:$4 sm:$0xff]   ;;  %v3318_v9 = vld [vmem:[#allocation5 + $0x388] ss:$16 sps:$4 sm:$0xff]  }
  0x97   :  { %1794 = vmatprep.subr.bf16.mxu0 %v3231_v10  ;;  %1958 = vmatprep.subr.bf16.mxu1 %v3233_v11  ;;  %v3323_v10 = vld [vmem:[#allocation5 + $0x3a4] ss:$16 sps:$4 sm:$0xff]   ;;  %v3326_v11 = vld [vmem:[#allocation5 + $0x3ac] ss:$16 sps:$4 sm:$0xff]  }
  0x9a   :  { %1795 = vmatpush1.bf16.msra.mxu0 %v3235_v14  ;;  %1959 = vmatpush1.bf16.msra.mxu1 %v3236_v15  ;;  %v3321_v14 = vld [vmem:[#allocation5 + $0x3a0] ss:$16 sps:$4 sm:$0xff]   ;;  %v3324_v15 = vld [vmem:[#allocation5 + $0x3a8] ss:$16 sps:$4 sm:$0xff]  }
  0x9b   :  { %1805 = vmatprep.subr.bf16.mxu0 %v3245_v17  ;;  %1969 = vmatprep.subr.bf16.mxu1 %v3248_v18  ;;  %v3332_v17 = vld [vmem:[#allocation5 + $0x3cc] ss:$16 sps:$4 sm:$0xff]   ;;  %v3327_v18 = vld [vmem:[#allocation5 + $0x3c0] ss:$16 sps:$4 sm:$0xff]  }
  0x9d   :  { %1797 = vmatmul.mubr.bf16.vlgmr.msra.gmra.mrb[0].mxu0 %v198_v22  ;;  %1961 = vmatmul.mubr.bf16.vlgmr.msra.gmra.mrb[0].mxu1 %v198_v22  ;;  %v3333_v22 = vld [vmem:[#allocation5 + $0x3e0] ss:$16 sps:$4 sm:$0xff]  }
  0x9e   :  { %1806 = vmatpush1.bf16.msra.mxu0 %v3243_v20  ;;  %1970 = vmatpush1.bf16.msra.mxu1 %v3246_v21  ;;  %v3335_v20 = vld [vmem:[#allocation5 + $0x3e4] ss:$16 sps:$4 sm:$0xff]   ;;  %v3338_v21 = vld [vmem:[#allocation5 + $0x3ec] ss:$16 sps:$4 sm:$0xff]  }
  0x9f   :  { %1807 = vmatprep.subr.bf16.mxu0 %v3251_v23  ;;  %1971 = vmatprep.subr.bf16.mxu1 %v3254_v24  ;;  %v3336_v23 = vld [vmem:[#allocation5 + $0x3e8] ss:$16 sps:$4 sm:$0xff]   ;;  %v152_v24 = vcombine.low %v3873_v12, %v3876_v13 }
  0xa0   :  { %1837 = vmatprep.mubr.bf16.mxu0 %v201_v25  ;;  %2001 = vmatprep.mubr.bf16.mxu1 %v201_v25  ;;  %v3341_v25 = vld [vmem:[#allocation5 + $0x404] ss:$16 sps:$4 sm:$0xff]   ;;  %v3435_v12 = vld [vmem:[#allocation2 + $0x8] ss:$16 sps:$4 sm:$0xff]  }
  0xa1   :  { %v3437_v13 = vld [vmem:[#allocation2 + $0x28] ss:$16 sps:$4 sm:$0xff]  }
  0xa2   :  { %1808 = vmatpush1.bf16.msra.mxu0 %v3249_v26  ;;  %1972 = vmatpush1.bf16.msra.mxu1 %v3252_v27  ;;  %v3344_v26 = vld [vmem:[#allocation5 + $0x40c] ss:$16 sps:$4 sm:$0xff]   ;;  %v3339_v27 = vld [vmem:[#allocation5 + $0x400] ss:$16 sps:$4 sm:$0xff]  }
  0xa3   :  { %1809 = vmatprep.subr.bf16.mxu0 %v3257_v28  ;;  %1973 = vmatprep.subr.bf16.mxu1 %v3260_v29  ;;  %v3342_v28 = vld [vmem:[#allocation5 + $0x408] ss:$16 sps:$4 sm:$0xff]   ;;  %v200_v29 = vpack.c.bf16 %v152_v24, %v152_v24  ;;  %v3417_v24 = vld [vmem:[#allocation5 + $0x5a0] ss:$16 sps:$4 sm:$0xff]  }
  0xa6   :  { %1810 = vmatpush1.bf16.msra.mxu0 %v3255_v30  ;;  %1974 = vmatpush1.bf16.msra.mxu1 %v3258_v31  ;;  %v3347_v30 = vld [vmem:[#allocation5 + $0x424] ss:$16 sps:$4 sm:$0xff]   ;;  %v3350_v31 = vld [vmem:[#allocation5 + $0x42c] ss:$16 sps:$4 sm:$0xff]  }
  0xa7   :  { %1811 = vmatprep.subr.bf16.mxu0 %v3263_v32  ;;  %1975 = vmatprep.subr.bf16.mxu1 %v3266_v33  ;;  %v3345_v32 = vld [vmem:[#allocation5 + $0x420] ss:$16 sps:$4 sm:$0xff]   ;;  %v3348_v33 = vld [vmem:[#allocation5 + $0x428] ss:$16 sps:$4 sm:$0xff]  }
  0xaa   :  { %1812 = vmatpush1.bf16.msra.mxu0 %v3261_v34  ;;  %1976 = vmatpush1.bf16.msra.mxu1 %v3264_v35  ;;  %v3353_v34 = vld [vmem:[#allocation5 + $0x444] ss:$16 sps:$4 sm:$0xff]   ;;  %v3356_v35 = vld [vmem:[#allocation5 + $0x44c] ss:$16 sps:$4 sm:$0xff]  }
  0xab   :  { %1813 = vmatprep.subr.bf16.mxu0 %v3269_v36  ;;  %1977 = vmatprep.subr.bf16.mxu1 %v3272_v37  ;;  %v3883_v36 = vrot.slane %v3435_v12, %v3868_v53  ;;  %v3886_v37 = vrot.slane %v3437_v13, %v3868_v53  ;;  %v3429_v12 = vld [vmem:[#allocation5 + $0x5e0] ss:$16 sps:$4 sm:$0xff]  }
  0xae   :  { %1814 = vmatpush1.bf16.msra.mxu0 %v3267_v38  ;;  %1978 = vmatpush1.bf16.msra.mxu1 %v3270_v39  ;;  %v3351_v38 = vld [vmem:[#allocation5 + $0x440] ss:$16 sps:$4 sm:$0xff]   ;;  %v3354_v39 = vld [vmem:[#allocation5 + $0x448] ss:$16 sps:$4 sm:$0xff]  }
  0xaf   :  { %1815 = vmatprep.subr.bf16.mxu0 %v3275_v40  ;;  %1979 = vmatprep.subr.bf16.mxu1 %v3278_v41  ;;  %v187_v40 = vcombine.high %v3883_v36, %v3886_v37  ;;  %v3359_v41 = vld [vmem:[#allocation5 + $0x464] ss:$16 sps:$4 sm:$0xff]  }
  0xb2   :  { %1816 = vmatpush1.bf16.msra.mxu0 %v3273_v42  ;;  %1980 = vmatpush1.bf16.msra.mxu1 %v3276_v43  ;;  %v3362_v42 = vld [vmem:[#allocation5 + $0x46c] ss:$16 sps:$4 sm:$0xff]   ;;  %v203_v43 = vpack.c.bf16 %v187_v40, %v187_v40 }
  0xb3   :  { %1817 = vmatprep.subr.bf16.mxu0 %v3281_v44  ;;  %1981 = vmatprep.subr.bf16.mxu1 %v3284_v45  ;;  %v3357_v44 = vld [vmem:[#allocation5 + $0x460] ss:$16 sps:$4 sm:$0xff]   ;;  %v3360_v45 = vld [vmem:[#allocation5 + $0x468] ss:$16 sps:$4 sm:$0xff]   ;;  %v3444_v40 = vld [vmem:[#allocation5 + $0x60c] ss:$16 sps:$4 sm:$0xff]  }
  0xb6   :  { %1818 = vmatpush1.bf16.msra.mxu0 %v3279_v47  ;;  %1982 = vmatpush1.bf16.msra.mxu1 %v3282_v48  ;;  %v3365_v47 = vld [vmem:[#allocation5 + $0x484] ss:$16 sps:$4 sm:$0xff]   ;;  %v3368_v48 = vld [vmem:[#allocation5 + $0x48c] ss:$16 sps:$4 sm:$0xff]  }
  0xb7   :  { %1819 = vmatprep.subr.bf16.mxu0 %v3287_v49  ;;  %1983 = vmatprep.subr.bf16.mxu1 %v3290_v50  ;;  %v3363_v49 = vld [vmem:[#allocation5 + $0x480] ss:$16 sps:$4 sm:$0xff]   ;;  %v3366_v50 = vld [vmem:[#allocation5 + $0x488] ss:$16 sps:$4 sm:$0xff]  }
  0xba   :  { %1820 = vmatpush1.bf16.msra.mxu0 %v3285_v51  ;;  %1984 = vmatpush1.bf16.msra.mxu1 %v3288_v52  ;;  %v3371_v51 = vld [vmem:[#allocation5 + $0x4a4] ss:$16 sps:$4 sm:$0xff]   ;;  %v3374_v52 = vld [vmem:[#allocation5 + $0x4ac] ss:$16 sps:$4 sm:$0xff]  }
  0xbb   :  { %1821 = vmatprep.subr.bf16.mxu0 %v3293_v54  ;;  %1985 = vmatprep.subr.bf16.mxu1 %v3296_v55  ;;  %v3369_v54 = vld [vmem:[#allocation5 + $0x4a0] ss:$16 sps:$4 sm:$0xff]   ;;  %v3372_v55 = vld [vmem:[#allocation5 + $0x4a8] ss:$16 sps:$4 sm:$0xff]  }
  0xbe   :  { %1822 = vmatpush1.bf16.msra.mxu0 %v3291_v56  ;;  %1986 = vmatpush1.bf16.msra.mxu1 %v3294_v57  ;;  %v3377_v56 = vld [vmem:[#allocation5 + $0x4c4] ss:$16 sps:$4 sm:$0xff]   ;;  %v3380_v57 = vld [vmem:[#allocation5 + $0x4cc] ss:$16 sps:$4 sm:$0xff]  }
  0xbf   :  { %1823 = vmatprep.subr.bf16.mxu0 %v3299_v58  ;;  %1987 = vmatprep.subr.bf16.mxu1 %v3302_v59  ;;  %v3375_v58 = vld [vmem:[#allocation5 + $0x4c0] ss:$16 sps:$4 sm:$0xff]   ;;  %v3378_v59 = vld [vmem:[#allocation5 + $0x4c8] ss:$16 sps:$4 sm:$0xff]  }
  0xc2   :  { %1824 = vmatpush1.bf16.msra.mxu0 %v3297_v60  ;;  %1988 = vmatpush1.bf16.msra.mxu1 %v3300_v61  ;;  %v3383_v60 = vld [vmem:[#allocation5 + $0x4e4] ss:$16 sps:$4 sm:$0xff]   ;;  %v3386_v61 = vld [vmem:[#allocation5 + $0x4ec] ss:$16 sps:$4 sm:$0xff]  }
  0xc3   :  { %1825 = vmatprep.subr.bf16.mxu0 %v3305_v62  ;;  %1989 = vmatprep.subr.bf16.mxu1 %v3308_v63  ;;  %v3381_v62 = vld [vmem:[#allocation5 + $0x4e0] ss:$16 sps:$4 sm:$0xff]   ;;  %v3384_v63 = vld [vmem:[#allocation5 + $0x4e8] ss:$16 sps:$4 sm:$0xff]  }
  0xc6   :  { %1826 = vmatpush1.bf16.msra.mxu0 %v3303_v0  ;;  %1990 = vmatpush1.bf16.msra.mxu1 %v3306_v1  ;;  %v3389_v0 = vld [vmem:[#allocation5 + $0x504] ss:$16 sps:$4 sm:$0xff]   ;;  %v3392_v1 = vld [vmem:[#allocation5 + $0x50c] ss:$16 sps:$4 sm:$0xff]  }
  0xc7   :  { %1827 = vmatprep.subr.bf16.mxu0 %v3311_v2  ;;  %1991 = vmatprep.subr.bf16.mxu1 %v3314_v3  ;;  %v3387_v2 = vld [vmem:[#allocation5 + $0x500] ss:$16 sps:$4 sm:$0xff]   ;;  %v3390_v3 = vld [vmem:[#allocation5 + $0x508] ss:$16 sps:$4 sm:$0xff]  }
  0xca   :  { %1828 = vmatpush1.bf16.msra.mxu0 %v3309_v4  ;;  %1992 = vmatpush1.bf16.msra.mxu1 %v3312_v5  ;;  %v3395_v4 = vld [vmem:[#allocation5 + $0x524] ss:$16 sps:$4 sm:$0xff]   ;;  %v3398_v5 = vld [vmem:[#allocation5 + $0x52c] ss:$16 sps:$4 sm:$0xff]  }
  0xcb   :  { %1829 = vmatprep.subr.bf16.mxu0 %v3317_v6  ;;  %1993 = vmatprep.subr.bf16.mxu1 %v3320_v7  ;;  %v3393_v6 = vld [vmem:[#allocation5 + $0x520] ss:$16 sps:$4 sm:$0xff]   ;;  %v3396_v7 = vld [vmem:[#allocation5 + $0x528] ss:$16 sps:$4 sm:$0xff]  }
  0xce   :  { %1830 = vmatpush1.bf16.msra.mxu0 %v3315_v8  ;;  %1994 = vmatpush1.bf16.msra.mxu1 %v3318_v9  ;;  %v3401_v8 = vld [vmem:[#allocation5 + $0x544] ss:$16 sps:$4 sm:$0xff]   ;;  %v3404_v9 = vld [vmem:[#allocation5 + $0x54c] ss:$16 sps:$4 sm:$0xff]  }
  0xcf   :  { %1831 = vmatprep.subr.bf16.mxu0 %v3323_v10  ;;  %1995 = vmatprep.subr.bf16.mxu1 %v3326_v11  ;;  %v3399_v10 = vld [vmem:[#allocation5 + $0x540] ss:$16 sps:$4 sm:$0xff]   ;;  %v3402_v11 = vld [vmem:[#allocation5 + $0x548] ss:$16 sps:$4 sm:$0xff]  }
  0xd2   :  { %1832 = vmatpush1.bf16.msra.mxu0 %v3321_v14  ;;  %1996 = vmatpush1.bf16.msra.mxu1 %v3324_v15  ;;  %v3407_v14 = vld [vmem:[#allocation5 + $0x564] ss:$16 sps:$4 sm:$0xff]   ;;  %v3410_v15 = vld [vmem:[#allocation5 + $0x56c] ss:$16 sps:$4 sm:$0xff]  }
  0xd3   :  { %1833 = vmatprep.subr.bf16.mxu0 %v3329_v16  ;;  %1997 = vmatprep.subr.bf16.mxu1 %v3332_v17  ;;  %v3405_v16 = vld [vmem:[#allocation5 + $0x560] ss:$16 sps:$4 sm:$0xff]   ;;  %v3408_v17 = vld [vmem:[#allocation5 + $0x568] ss:$16 sps:$4 sm:$0xff]  }
  0xd6   :  { %1834 = vmatpush1.bf16.msra.mxu0 %v3327_v18  ;;  %1998 = vmatpush1.bf16.msra.mxu1 %v3330_v19  ;;  %v3413_v18 = vld [vmem:[#allocation5 + $0x584] ss:$16 sps:$4 sm:$0xff]   ;;  %v3416_v19 = vld [vmem:[#allocation5 + $0x58c] ss:$16 sps:$4 sm:$0xff]  }
  0xd7   :  { %1835 = vmatprep.subr.bf16.mxu0 %v3335_v20  ;;  %1999 = vmatprep.subr.bf16.mxu1 %v3338_v21  ;;  %v3411_v20 = vld [vmem:[#allocation5 + $0x580] ss:$16 sps:$4 sm:$0xff]   ;;  %v3414_v21 = vld [vmem:[#allocation5 + $0x588] ss:$16 sps:$4 sm:$0xff]  }
  0xda   :  { %1836 = vmatpush1.bf16.msra.mxu0 %v3333_v22  ;;  %2000 = vmatpush1.bf16.msra.mxu1 %v3336_v23  ;;  %v3419_v22 = vld [vmem:[#allocation5 + $0x5a4] ss:$16 sps:$4 sm:$0xff]   ;;  %v3422_v23 = vld [vmem:[#allocation5 + $0x5ac] ss:$16 sps:$4 sm:$0xff]  }
  0xdb   :  { %1846 = vmatprep.subr.bf16.mxu0 %v3341_v25  ;;  %2010 = vmatprep.subr.bf16.mxu1 %v3344_v26  ;;  %v3420_v25 = vld [vmem:[#allocation5 + $0x5a8] ss:$16 sps:$4 sm:$0xff]   ;;  %v3425_v26 = vld [vmem:[#allocation5 + $0x5c4] ss:$16 sps:$4 sm:$0xff]  }
  0xdd   :  { %1838 = vmatmul.mubr.bf16.vlgmr.msra.gmra.mrb[0].mxu0 %v200_v29  ;;  %2002 = vmatmul.mubr.bf16.vlgmr.msra.gmra.mrb[0].mxu1 %v200_v29  ;;  %v3423_v29 = vld [vmem:[#allocation5 + $0x5c0] ss:$16 sps:$4 sm:$0xff]  }
  0xde   :  { %1847 = vmatpush1.bf16.msra.mxu0 %v3339_v27  ;;  %2011 = vmatpush1.bf16.msra.mxu1 %v3342_v28  ;;  %v3428_v27 = vld [vmem:[#allocation5 + $0x5cc] ss:$16 sps:$4 sm:$0xff]  }
  0xdf   :  { %1848 = vmatprep.subr.bf16.mxu0 %v3347_v30  ;;  %2012 = vmatprep.subr.bf16.mxu1 %v3350_v31  ;;  %v3535_v28 = vld [vmem:[#allocation2 + $0xc] ss:$16 sps:$4 sm:$0xff]   ;;  %v3426_v31 = vld [vmem:[#allocation5 + $0x5c8] ss:$16 sps:$4 sm:$0xff]  }
  0xe0   :  { %1878 = vmatprep.mubr.bf16.mxu0 %v203_v43  ;;  %2042 = vmatprep.mubr.bf16.mxu1 %v203_v43  ;;  %v3536_v30 = vld [vmem:[#allocation2 + $0x2c] ss:$16 sps:$4 sm:$0xff]   ;;  %v3891_v13 = vrot.slane %v3535_v28, %v3868_v53  ;;  %v3442_v43 = vld [vmem:[#allocation5 + $0x608] ss:$16 sps:$4 sm:$0xff]  }
  0xe1   :  { %v3516_v28 = vld [vmem:[#allocation5 + $0x78c] ss:$16 sps:$4 sm:$0xff]  }
  0xe2   :  { %1849 = vmatpush1.bf16.msra.mxu0 %v3345_v32  ;;  %2013 = vmatpush1.bf16.msra.mxu1 %v3348_v33  ;;  %v3431_v32 = vld [vmem:[#allocation5 + $0x5e4] ss:$16 sps:$4 sm:$0xff]   ;;  %v3434_v33 = vld [vmem:[#allocation5 + $0x5ec] ss:$16 sps:$4 sm:$0xff]  }
  0xe3   :  { %1850 = vmatprep.subr.bf16.mxu0 %v3353_v34  ;;  %2014 = vmatprep.subr.bf16.mxu1 %v3356_v35  ;;  %v3894_v34 = vrot.slane %v3536_v30, %v3868_v53  ;;  %v3432_v35 = vld [vmem:[#allocation5 + $0x5e8] ss:$16 sps:$4 sm:$0xff]   ;;  %v3447_v53 = vld [vmem:[#allocation5 + $0x624] ss:$16 sps:$4 sm:$0xff]  }
  0xe4   :  { %v3514_v30 = vld [vmem:[#allocation5 + $0x788] ss:$16 sps:$4 sm:$0xff]  }
  0xe6   :  { %1851 = vmatpush1.bf16.msra.mxu0 %v3351_v38  ;;  %2015 = vmatpush1.bf16.msra.mxu1 %v3354_v39  ;;  %v186_v38 = vcombine.low %v3883_v36, %v3886_v37  ;;  %v3441_v39 = vld [vmem:[#allocation5 + $0x604] ss:$16 sps:$4 sm:$0xff]   ;;  %v3448_v37 = vld [vmem:[#allocation5 + $0x628] ss:$16 sps:$4 sm:$0xff]  }
  0xe7   :  { %1852 = vmatprep.subr.bf16.mxu0 %v3359_v41  ;;  %2016 = vmatprep.subr.bf16.mxu1 %v3362_v42  ;;  %v3439_v41 = vld [vmem:[#allocation5 + $0x600] ss:$16 sps:$4 sm:$0xff]   ;;  %v189_v42 = vcombine.high %v3891_v13, %v3894_v34 }
  0xe9   :  { %v205_v36 = vpack.c.bf16 %v189_v42, %v189_v42  ;;  %v3534_v42 = vld [vmem:[#allocation5 + $0x7ec] ss:$16 sps:$4 sm:$0xff]  }
  0xea   :  { %1853 = vmatpush1.bf16.msra.mxu0 %v3357_v44  ;;  %2017 = vmatpush1.bf16.msra.mxu1 %v3360_v45  ;;  %v202_v44 = vpack.c.bf16 %v186_v38, %v186_v38  ;;  %v3450_v45 = vld [vmem:[#allocation5 + $0x62c] ss:$16 sps:$4 sm:$0xff]  }
  0xeb   :  { %1854 = vmatprep.subr.bf16.mxu0 %v3365_v47  ;;  %2018 = vmatprep.subr.bf16.mxu1 %v3368_v48  ;;  %v3445_v47 = vld [vmem:[#allocation5 + $0x620] ss:$16 sps:$4 sm:$0xff]   ;;  %v3453_v48 = vld [vmem:[#allocation5 + $0x644] ss:$16 sps:$4 sm:$0xff]   ;;  %v3528_v38 = vld [vmem:[#allocation5 + $0x7cc] ss:$16 sps:$4 sm:$0xff]  }
  0xee   :  { %1855 = vmatpush1.bf16.msra.mxu0 %v3363_v49  ;;  %2019 = vmatpush1.bf16.msra.mxu1 %v3366_v50  ;;  %v3456_v49 = vld [vmem:[#allocation5 + $0x64c] ss:$16 sps:$4 sm:$0xff]   ;;  %v3451_v50 = vld [vmem:[#allocation5 + $0x640] ss:$16 sps:$4 sm:$0xff]  }
  0xef   :  { %1856 = vmatprep.subr.bf16.mxu0 %v3371_v51  ;;  %2020 = vmatprep.subr.bf16.mxu1 %v3374_v52  ;;  %v3454_v51 = vld [vmem:[#allocation5 + $0x648] ss:$16 sps:$4 sm:$0xff]   ;;  %v3459_v52 = vld [vmem:[#allocation5 + $0x664] ss:$16 sps:$4 sm:$0xff]  }
  0xf2   :  { %1857 = vmatpush1.bf16.msra.mxu0 %v3369_v54  ;;  %2021 = vmatpush1.bf16.msra.mxu1 %v3372_v55  ;;  %v3462_v54 = vld [vmem:[#allocation5 + $0x66c] ss:$16 sps:$4 sm:$0xff]   ;;  %v3457_v55 = vld [vmem:[#allocation5 + $0x660] ss:$16 sps:$4 sm:$0xff]  }
  0xf3   :  { %1858 = vmatprep.subr.bf16.mxu0 %v3377_v56  ;;  %2022 = vmatprep.subr.bf16.mxu1 %v3380_v57  ;;  %v3460_v56 = vld [vmem:[#allocation5 + $0x668] ss:$16 sps:$4 sm:$0xff]   ;;  %v3465_v57 = vld [vmem:[#allocation5 + $0x684] ss:$16 sps:$4 sm:$0xff]  }
  0xf6   :  { %1859 = vmatpush1.bf16.msra.mxu0 %v3375_v58  ;;  %2023 = vmatpush1.bf16.msra.mxu1 %v3378_v59  ;;  %v3468_v58 = vld [vmem:[#allocation5 + $0x68c] ss:$16 sps:$4 sm:$0xff]   ;;  %v3463_v59 = vld [vmem:[#allocation5 + $0x680] ss:$16 sps:$4 sm:$0xff]  }
  0xf7   :  { %1860 = vmatprep.subr.bf16.mxu0 %v3383_v60  ;;  %2024 = vmatprep.subr.bf16.mxu1 %v3386_v61  ;;  %v3466_v60 = vld [vmem:[#allocation5 + $0x688] ss:$16 sps:$4 sm:$0xff]   ;;  %v3471_v61 = vld [vmem:[#allocation5 + $0x6a4] ss:$16 sps:$4 sm:$0xff]  }
  0xfa   :  { %1861 = vmatpush1.bf16.msra.mxu0 %v3381_v62  ;;  %2025 = vmatpush1.bf16.msra.mxu1 %v3384_v63  ;;  %v3474_v62 = vld [vmem:[#allocation5 + $0x6ac] ss:$16 sps:$4 sm:$0xff]   ;;  %v3469_v63 = vld [vmem:[#allocation5 + $0x6a0] ss:$16 sps:$4 sm:$0xff]  }
  0xfb   :  { %1862 = vmatprep.subr.bf16.mxu0 %v3389_v0  ;;  %2026 = vmatprep.subr.bf16.mxu1 %v3392_v1  ;;  %v3472_v0 = vld [vmem:[#allocation5 + $0x6a8] ss:$16 sps:$4 sm:$0xff]   ;;  %v3477_v1 = vld [vmem:[#allocation5 + $0x6c4] ss:$16 sps:$4 sm:$0xff]  }
  0xfe   :  { %1863 = vmatpush1.bf16.msra.mxu0 %v3387_v2  ;;  %2027 = vmatpush1.bf16.msra.mxu1 %v3390_v3  ;;  %v3480_v2 = vld [vmem:[#allocation5 + $0x6cc] ss:$16 sps:$4 sm:$0xff]   ;;  %v3475_v3 = vld [vmem:[#allocation5 + $0x6c0] ss:$16 sps:$4 sm:$0xff]  }
  0xff   :  { %1864 = vmatprep.subr.bf16.mxu0 %v3395_v4  ;;  %2028 = vmatprep.subr.bf16.mxu1 %v3398_v5  ;;  %v3478_v4 = vld [vmem:[#allocation5 + $0x6c8] ss:$16 sps:$4 sm:$0xff]   ;;  %v3483_v5 = vld [vmem:[#allocation5 + $0x6e4] ss:$16 sps:$4 sm:$0xff]  }
 0x102   :  { %1865 = vmatpush1.bf16.msra.mxu0 %v3393_v6  ;;  %2029 = vmatpush1.bf16.msra.mxu1 %v3396_v7  ;;  %v3486_v6 = vld [vmem:[#allocation5 + $0x6ec] ss:$16 sps:$4 sm:$0xff]   ;;  %v3481_v7 = vld [vmem:[#allocation5 + $0x6e0] ss:$16 sps:$4 sm:$0xff]  }
 0x103   :  { %1866 = vmatprep.subr.bf16.mxu0 %v3401_v8  ;;  %2030 = vmatprep.subr.bf16.mxu1 %v3404_v9  ;;  %v3484_v8 = vld [vmem:[#allocation5 + $0x6e8] ss:$16 sps:$4 sm:$0xff]   ;;  %v3489_v9 = vld [vmem:[#allocation5 + $0x704] ss:$16 sps:$4 sm:$0xff]  }
 0x106   :  { %1867 = vmatpush1.bf16.msra.mxu0 %v3399_v10  ;;  %2031 = vmatpush1.bf16.msra.mxu1 %v3402_v11  ;;  %v3492_v10 = vld [vmem:[#allocation5 + $0x70c] ss:$16 sps:$4 sm:$0xff]   ;;  %v3487_v11 = vld [vmem:[#allocation5 + $0x700] ss:$16 sps:$4 sm:$0xff]  }
 0x107   :  { %1868 = vmatprep.subr.bf16.mxu0 %v3407_v14  ;;  %2032 = vmatprep.subr.bf16.mxu1 %v3410_v15  ;;  %v3490_v14 = vld [vmem:[#allocation5 + $0x708] ss:$16 sps:$4 sm:$0xff]   ;;  %v3495_v15 = vld [vmem:[#allocation5 + $0x724] ss:$16 sps:$4 sm:$0xff]  }
 0x10a   :  { %1869 = vmatpush1.bf16.msra.mxu0 %v3405_v16  ;;  %2033 = vmatpush1.bf16.msra.mxu1 %v3408_v17  ;;  %v3498_v16 = vld [vmem:[#allocation5 + $0x72c] ss:$16 sps:$4 sm:$0xff]   ;;  %v3493_v17 = vld [vmem:[#allocation5 + $0x720] ss:$16 sps:$4 sm:$0xff]  }
 0x10b   :  { %1870 = vmatprep.subr.bf16.mxu0 %v3413_v18  ;;  %2034 = vmatprep.subr.bf16.mxu1 %v3416_v19  ;;  %v3496_v18 = vld [vmem:[#allocation5 + $0x728] ss:$16 sps:$4 sm:$0xff]   ;;  %v3501_v19 = vld [vmem:[#allocation5 + $0x744] ss:$16 sps:$4 sm:$0xff]  }
 0x10e   :  { %1871 = vmatpush1.bf16.msra.mxu0 %v3411_v20  ;;  %2035 = vmatpush1.bf16.msra.mxu1 %v3414_v21  ;;  %v3504_v20 = vld [vmem:[#allocation5 + $0x74c] ss:$16 sps:$4 sm:$0xff]   ;;  %v3499_v21 = vld [vmem:[#allocation5 + $0x740] ss:$16 sps:$4 sm:$0xff]  }
 0x10f   :  { %1872 = vmatprep.subr.bf16.mxu0 %v3419_v22  ;;  %2036 = vmatprep.subr.bf16.mxu1 %v3422_v23  ;;  %v3502_v22 = vld [vmem:[#allocation5 + $0x748] ss:$16 sps:$4 sm:$0xff]   ;;  %v3507_v23 = vld [vmem:[#allocation5 + $0x764] ss:$16 sps:$4 sm:$0xff]  }
 0x112   :  { %1873 = vmatpush1.bf16.msra.mxu0 %v3417_v24  ;;  %2037 = vmatpush1.bf16.msra.mxu1 %v3420_v25  ;;  %v3510_v24 = vld [vmem:[#allocation5 + $0x76c] ss:$16 sps:$4 sm:$0xff]   ;;  %v3505_v25 = vld [vmem:[#allocation5 + $0x760] ss:$16 sps:$4 sm:$0xff]  }
 0x113   :  { %1874 = vmatprep.subr.bf16.mxu0 %v3425_v26  ;;  %2038 = vmatprep.subr.bf16.mxu1 %v3428_v27  ;;  %v3508_v26 = vld [vmem:[#allocation5 + $0x768] ss:$16 sps:$4 sm:$0xff]   ;;  %v3513_v27 = vld [vmem:[#allocation5 + $0x784] ss:$16 sps:$4 sm:$0xff]  }
 0x116   :  { %1875 = vmatpush1.bf16.msra.mxu0 %v3423_v29  ;;  %2039 = vmatpush1.bf16.msra.mxu1 %v3426_v31  ;;  %v3511_v29 = vld [vmem:[#allocation5 + $0x780] ss:$16 sps:$4 sm:$0xff]   ;;  %v3519_v31 = vld [vmem:[#allocation5 + $0x7a4] ss:$16 sps:$4 sm:$0xff]  }
 0x117   :  { %1876 = vmatprep.subr.bf16.mxu0 %v3431_v32  ;;  %2040 = vmatprep.subr.bf16.mxu1 %v3434_v33  ;;  %v3522_v32 = vld [vmem:[#allocation5 + $0x7ac] ss:$16 sps:$4 sm:$0xff]   ;;  %v3517_v33 = vld [vmem:[#allocation5 + $0x7a0] ss:$16 sps:$4 sm:$0xff]  }
 0x11a   :  { %1877 = vmatpush1.bf16.msra.mxu0 %v3429_v12  ;;  %2041 = vmatpush1.bf16.msra.mxu1 %v3432_v35  ;;  %v3520_v12 = vld [vmem:[#allocation5 + $0x7a8] ss:$16 sps:$4 sm:$0xff]   ;;  %v3525_v35 = vld [vmem:[#allocation5 + $0x7c4] ss:$16 sps:$4 sm:$0xff]  }
 0x11b   :  { %1887 = vmatprep.subr.bf16.mxu0 %v3441_v39  ;;  %2051 = vmatprep.subr.bf16.mxu1 %v3444_v40  ;;  %v3523_v39 = vld [vmem:[#allocation5 + $0x7c0] ss:$16 sps:$4 sm:$0xff]   ;;  %v3526_v40 = vld [vmem:[#allocation5 + $0x7c8] ss:$16 sps:$4 sm:$0xff]  }
 0x11d   :  { %1879 = vmatmul.mubr.bf16.vlgmr.msra.gmra.mrb[0].mxu0 %v202_v44  ;;  %2043 = vmatmul.mubr.bf16.vlgmr.msra.gmra.mrb[0].mxu1 %v202_v44  ;;  %v3529_v44 = vld [vmem:[#allocation5 + $0x7e0] ss:$16 sps:$4 sm:$0xff]  }
 0x11e   :  { %1888 = vmatpush1.bf16.msra.mxu0 %v3439_v41  ;;  %2052 = vmatpush1.bf16.msra.mxu1 %v3442_v43  ;;  %v3531_v41 = vld [vmem:[#allocation5 + $0x7e4] ss:$16 sps:$4 sm:$0xff]   ;;  %v188_v43 = vcombine.low %v3891_v13, %v3894_v34  ;;  %v3543_v13 = vld [vmem:[#allocation7 + $0x8] sm:$0xff]  }
 0x11f   :  { %1889 = vmatprep.subr.bf16.mxu0 %v3447_v53  ;;  %2053 = vmatprep.subr.bf16.mxu1 %v3450_v45  ;;  %v3532_v53 = vld [vmem:[#allocation5 + $0x7e8] ss:$16 sps:$4 sm:$0xff]   ;;  %v3537_v45 = vld [vmem:[#allocation7 + $0x40] sm:$0xff]  }
 0x120   :  { %1919 = vmatprep.mubr.bf16.mxu0 %v205_v36  ;;  %2083 = vmatprep.mubr.bf16.mxu1 %v205_v36  ;;  %v204_v36 = vpack.c.bf16 %v188_v43, %v188_v43  ;;  %v3544_v34 = vld [vmem:[#allocation7 + $0x88] sm:$0xff]   ;;  %v3569_v43 = vld [vmem:[#allocation8] sm:$0xff]  }
 0x122   :  { %1890 = vmatpush1.bf16.msra.mxu0 %v3445_v47  ;;  %2054 = vmatpush1.bf16.msra.mxu1 %v3448_v37  ;;  %v3538_v47 = vld [vmem:[#allocation7 + $0xc0] sm:$0xff]  }
 0x123   :  { %1891 = vmatprep.subr.bf16.mxu0 %v3453_v48  ;;  %2055 = vmatprep.subr.bf16.mxu1 %v3456_v49  ;;  %v3539_v37 = vld [vmem:[#allocation7] sm:$0xff]   ;;  %v3541_v49 = vld [vmem:[#allocation7 + $0x48] sm:$0xff]  }
 0x124   :  { %v3540_v48 = vld [vmem:[#allocation7 + $0x80] sm:$0xff]  }
 0x126   :  { %1892 = vmatpush1.bf16.msra.mxu0 %v3451_v50  ;;  %2056 = vmatpush1.bf16.msra.mxu1 %v3454_v51  ;;  %v3542_v50 = vld [vmem:[#allocation7 + $0xc8] sm:$0xff]   ;;  %v3545_v51 = vld [vmem:[#allocation7 + $0x50] sm:$0xff]  }
 0x127   :  { %1893 = vmatprep.subr.bf16.mxu0 %v3459_v52  ;;  %2057 = vmatprep.subr.bf16.mxu1 %v3462_v54  ;;  %v3546_v52 = vld [vmem:[#allocation7 + $0xd0] sm:$0xff]  }
 0x128   :  { %v3547_v54 = vld [vmem:[#allocation7 + $0x10] sm:$0xff]  }
 0x12a   :  { %1894 = vmatpush1.bf16.msra.mxu0 %v3457_v55  ;;  %2058 = vmatpush1.bf16.msra.mxu1 %v3460_v56  ;;  %v3548_v55 = vld [vmem:[#allocation7 + $0x90] sm:$0xff]   ;;  %v3549_v56 = vld [vmem:[#allocation7 + $0x58] sm:$0xff]  }
 0x12b   :  { %1895 = vmatprep.subr.bf16.mxu0 %v3465_v57  ;;  %2059 = vmatprep.subr.bf16.mxu1 %v3468_v58  ;;  %v3550_v57 = vld [vmem:[#allocation7 + $0xd8] sm:$0xff]  }
 0x12c   :  { %v3551_v58 = vld [vmem:[#allocation7 + $0x18] sm:$0xff]  }
 0x12e   :  { %1896 = vmatpush1.bf16.msra.mxu0 %v3463_v59  ;;  %2060 = vmatpush1.bf16.msra.mxu1 %v3466_v60  ;;  %v3552_v59 = vld [vmem:[#allocation7 + $0x98] sm:$0xff]   ;;  %v3553_v60 = vld [vmem:[#allocation7 + $0x60] sm:$0xff]  }
 0x12f   :  { %1897 = vmatprep.subr.bf16.mxu0 %v3471_v61  ;;  %2061 = vmatprep.subr.bf16.mxu1 %v3474_v62  ;;  %v3554_v61 = vld [vmem:[#allocation7 + $0xe0] sm:$0xff]  }
 0x130   :  { %v3555_v62 = vld [vmem:[#allocation7 + $0x20] sm:$0xff]  }
 0x132   :  { %1898 = vmatpush1.bf16.msra.mxu0 %v3469_v63  ;;  %2062 = vmatpush1.bf16.msra.mxu1 %v3472_v0  ;;  %v3556_v63 = vld [vmem:[#allocation7 + $0xa0] sm:$0xff]   ;;  %v3557_v0 = vld [vmem:[#allocation7 + $0x68] sm:$0xff]  }
 0x133   :  { %1899 = vmatprep.subr.bf16.mxu0 %v3477_v1  ;;  %2063 = vmatprep.subr.bf16.mxu1 %v3480_v2  ;;  %v3558_v1 = vld [vmem:[#allocation7 + $0xe8] sm:$0xff]  }
 0x134   :  { %v3559_v2 = vld [vmem:[#allocation7 + $0x28] sm:$0xff]  }
 0x136   :  { %1900 = vmatpush1.bf16.msra.mxu0 %v3475_v3  ;;  %2064 = vmatpush1.bf16.msra.mxu1 %v3478_v4  ;;  %v3560_v3 = vld [vmem:[#allocation7 + $0xa8] sm:$0xff]   ;;  %v3561_v4 = vld [vmem:[#allocation7 + $0x70] sm:$0xff]  }
 0x137   :  { %1901 = vmatprep.subr.bf16.mxu0 %v3483_v5  ;;  %2065 = vmatprep.subr.bf16.mxu1 %v3486_v6  ;;  %v3562_v5 = vld [vmem:[#allocation7 + $0xf0] sm:$0xff]  }
 0x138   :  { %v3563_v6 = vld [vmem:[#allocation7 + $0x30] sm:$0xff]  }
 0x13a   :  { %1902 = vmatpush1.bf16.msra.mxu0 %v3481_v7  ;;  %2066 = vmatpush1.bf16.msra.mxu1 %v3484_v8  ;;  %v3564_v7 = vld [vmem:[#allocation7 + $0xb0] sm:$0xff]   ;;  %v3565_v8 = vld [vmem:[#allocation7 + $0x78] sm:$0xff]  }
 0x13b   :  { %1903 = vmatprep.subr.bf16.mxu0 %v3489_v9  ;;  %2067 = vmatprep.subr.bf16.mxu1 %v3492_v10  ;;  %v3566_v9 = vld [vmem:[#allocation7 + $0xf8] sm:$0xff]  }
 0x13c   :  { %v3567_v10 = vld [vmem:[#allocation7 + $0x38] sm:$0xff]  }
 0x13e   :  { %1904 = vmatpush1.bf16.msra.mxu0 %v3487_v11  ;;  %2068 = vmatpush1.bf16.msra.mxu1 %v3490_v14  ;;  %v3568_v11 = vld [vmem:[#allocation7 + $0xb8] sm:$0xff]   ;;  %v3735_v14 = vmov 0.0  }
 0x13f   :  { %1905 = vmatprep.subr.bf16.mxu0 %v3495_v15  ;;  %2069 = vmatprep.subr.bf16.mxu1 %v3498_v16  ;;  %v466_v15 = vsub.s32 0, %v3865_v46  ;;  %v474_v16 = vsub.s32 2, %v3865_v46 }
 0x142   :  { %1906 = vmatpush1.bf16.msra.mxu0 %v3493_v17  ;;  %2070 = vmatpush1.bf16.msra.mxu1 %v3496_v18  ;;  %v462_v17 = vld [vmem:[%s3950_s2] sm:$0xf]  ;;  %v470_v18 = vsub.s32 1, %v3865_v46 }
 0x143   :  { %1907 = vmatprep.subr.bf16.mxu0 %v3501_v19  ;;  %2071 = vmatprep.subr.bf16.mxu1 %v3504_v20  ;;  %v478_v19 = vsub.s32 3, %v3865_v46  ;;  %v467_v20 = vrot.slane %v462_v17, %v466_v15 }
 0x146   :  { %1908 = vmatpush1.bf16.msra.mxu0 %v3499_v21  ;;  %2072 = vmatpush1.bf16.msra.mxu1 %v3502_v22  ;;  %v475_v21 = vrot.slane %v462_v17, %v474_v16  ;;  %v471_v22 = vrot.slane %v462_v17, %v470_v18 }
 0x147   :  { %1909 = vmatprep.subr.bf16.mxu0 %v3507_v23  ;;  %2073 = vmatprep.subr.bf16.mxu1 %v3510_v24  ;;  %v479_v23 = vrot.slane %v462_v17, %v478_v19 }
 0x14a   :  { %1910 = vmatpush1.bf16.msra.mxu0 %v3505_v25  ;;  %2074 = vmatpush1.bf16.msra.mxu1 %v3508_v26 }
 0x14b   :  { %1911 = vmatprep.subr.bf16.mxu0 %v3513_v27  ;;  %2075 = vmatprep.subr.bf16.mxu1 %v3516_v28 }
 0x14e   :  { %1912 = vmatpush1.bf16.msra.mxu0 %v3511_v29  ;;  %2076 = vmatpush1.bf16.msra.mxu1 %v3514_v30 }
 0x14f   :  { %1913 = vmatprep.subr.bf16.mxu0 %v3519_v31  ;;  %2077 = vmatprep.subr.bf16.mxu1 %v3522_v32 }
 0x152   :  { %1914 = vmatpush1.bf16.msra.mxu0 %v3517_v33  ;;  %2078 = vmatpush1.bf16.msra.mxu1 %v3520_v12 }
 0x153   :  { %1915 = vmatprep.subr.bf16.mxu0 %v3525_v35  ;;  %2079 = vmatprep.subr.bf16.mxu1 %v3528_v38 }
 0x156   :  { %1916 = vmatpush1.bf16.msra.mxu0 %v3523_v39  ;;  %2080 = vmatpush1.bf16.msra.mxu1 %v3526_v40 }
 0x157   :  { %1917 = vmatprep.subr.bf16.mxu0 %v3531_v41  ;;  %2081 = vmatprep.subr.bf16.mxu1 %v3534_v42 }
 0x15a   :  { %1918 = vmatpush1.bf16.msra.mxu0 %v3529_v44  ;;  %2082 = vmatpush1.bf16.msra.mxu1 %v3532_v53 }
 0x15b   :  { %2996 = vmatprep.subr.bf16.mxu0 %v3537_v45  ;;  %3018 = vmatprep.subr.bf16.mxu1 %v3538_v47  ;;  %v3570_v45 = vld [vmem:[#allocation8 + $0x8] sm:$0xff]   ;;  %v3571_v47 = vld [vmem:[#allocation8 + $0x10] sm:$0xff]  }
 0x15d   :  { %1920 = vmatmul.mubr.bf16.vlgmr.msra.gmra.mrb[0].mxu0 %v204_v36  ;;  %2084 = vmatmul.mubr.bf16.vlgmr.msra.gmra.mrb[0].mxu1 %v204_v36  ;;  %v3572_v36 = vld [vmem:[#allocation8 + $0x18] sm:$0xff]  }
 0x15e   :  { %2997 = vmatpush3.bf16.msra.mxu0 %v3539_v37  ;;  %3019 = vmatpush3.bf16.msra.mxu1 %v3540_v48  ;;  %v3573_v37 = vld [vmem:[#allocation8 + $0x20] sm:$0xff]   ;;  %v3574_v48 = vld [vmem:[#allocation8 + $0x28] sm:$0xff]  }
 0x15f   :  { %2998 = vmatprep.subr.bf16.mxu0 %v3541_v49  ;;  %3020 = vmatprep.subr.bf16.mxu1 %v3542_v50  ;;  %v3575_v49 = vld [vmem:[#allocation8 + $0x30] sm:$0xff]   ;;  %v3576_v50 = vld [vmem:[#allocation8 + $0x38] sm:$0xff]  }
 0x162   :  { %2999 = vmatpush3.bf16.msra.mxu0 %v3543_v13  ;;  %3021 = vmatpush3.bf16.msra.mxu1 %v3544_v34  ;;  %v3577_v13 = vld [vmem:[#allocation10] sm:$0xff]   ;;  %v3578_v34 = vld [vmem:[#allocation10 + $0x8] sm:$0xff]  }
 0x163   :  { %3000 = vmatprep.subr.bf16.mxu0 %v3545_v51  ;;  %3022 = vmatprep.subr.bf16.mxu1 %v3546_v52  ;;  %v3579_v51 = vld [vmem:[#allocation10 + $0x10] sm:$0xff]   ;;  %v3580_v52 = vld [vmem:[#allocation10 + $0x18] sm:$0xff]  }
 0x166   :  { %3001 = vmatpush3.bf16.msra.mxu0 %v3547_v54  ;;  %3023 = vmatpush3.bf16.msra.mxu1 %v3548_v55  ;;  %v3581_v54 = vld [vmem:[#allocation10 + $0x20] sm:$0xff]   ;;  %v3582_v55 = vld [vmem:[#allocation10 + $0x28] sm:$0xff]  }
 0x167   :  { %3002 = vmatprep.subr.bf16.mxu0 %v3549_v56  ;;  %3024 = vmatprep.subr.bf16.mxu1 %v3550_v57 }
 0x16a   :  { %3003 = vmatpush3.bf16.msra.mxu0 %v3551_v58  ;;  %3025 = vmatpush3.bf16.msra.mxu1 %v3552_v59  ;;  %v2945_v58 = vld [vmem:[%s3952_s4] ss:$0 sm:$0xff] }
 0x16b   :  { %3004 = vmatprep.subr.bf16.mxu0 %v3553_v60  ;;  %3026 = vmatprep.subr.bf16.mxu1 %v3554_v61 }
 0x16e   :  { %3005 = vmatpush3.bf16.msra.mxu0 %v3555_v62  ;;  %3027 = vmatpush3.bf16.msra.mxu1 %v3556_v63 }
 0x16f   :  { %3006 = vmatprep.subr.bf16.mxu0 %v3557_v0  ;;  %3028 = vmatprep.subr.bf16.mxu1 %v3558_v1 }
 0x172   :  { %3007 = vmatpush3.bf16.msra.mxu0 %v3559_v2  ;;  %3029 = vmatpush3.bf16.msra.mxu1 %v3560_v3 }
 0x173   :  { %3008 = vmatprep.subr.bf16.mxu0 %v3561_v4  ;;  %3030 = vmatprep.subr.bf16.mxu1 %v3562_v5 }
 0x176   :  { %3009 = vmatpush3.bf16.msra.mxu0 %v3563_v6  ;;  %3031 = vmatpush3.bf16.msra.mxu1 %v3564_v7  ;;  %v3583_v7 = vld [vmem:[#allocation10 + $0x30] sm:$0xff]  }
 0x177   :  { %3010 = vmatprep.subr.bf16.mxu0 %v3565_v8  ;;  %3032 = vmatprep.subr.bf16.mxu1 %v3566_v9  ;;  %v3584_v8 = vld [vmem:[#allocation10 + $0x38] sm:$0xff]   ;;  %v2978_v9 = vld [vmem:[%s3954_s6] ss:$0 sm:$0xff] }
 0x17a   :  { %3011 = vmatpush3.bf16.msra.mxu0 %v3567_v10  ;;  %3033 = vmatpush3.bf16.msra.mxu1 %v3568_v11 }
 0x17b   :  { %3058 = vmatprep.subr.bf16.mxu0 %v3735_v14  ;;  %3078 = vmatprep.subr.bf16.mxu1 %v3735_v14 }
 0x230   :  { %v1921_v24 = vpop.f32.mrb[0].mxu0  ;;  %v2085_v25 = vpop.f32.mrb[0].mxu1 }
 0x231   :  { %v3098_v26 = vadd.f32 %v1921_v24, %v467_v20  ;;  %v3100_v27 = vadd.f32 %v2085_v25, %v475_v21  ;;  %v1923_v28 = vpop.f32.mrb[1].mxu0  ;;  %v2087_v29 = vpop.f32.mrb[1].mxu1  ;;  %v2987_v20 = vld [vmem:[%s3956_s8] ss:$0 sm:$0xff] }
 0x232   :  { %v3099_v30 = vadd.f32 %v1923_v28, %v471_v22  ;;  %v3101_v31 = vadd.f32 %v2087_v29, %v479_v23  ;;  %v1925_v32 = vpop.f32.mrb[2].mxu0  ;;  %v2089_v33 = vpop.f32.mrb[2].mxu1 }
 0x233   :  { %v2092_v12 = vmax.f32 %v3098_v26, 0.0  ;;  %v2094_v35 = vmax.f32 %v3100_v27, 0.0  ;;  %v1926_v38 = vpop.f32.mrb[3].mxu0  ;;  %v2090_v39 = vpop.f32.mrb[3].mxu1 }
 0x234   :  { %v2093_v40 = vmax.f32 %v3099_v30, 0.0  ;;  %v2095_v46 = vmax.f32 %v3101_v31, 0.0 }
 0x235   :  { %v2096_v44 = vpack.c.bf16 %v2092_v12, %v2092_v12  ;;  %v2098_v53 = vpack.c.bf16 %v2094_v35, %v2094_v35 }
 0x236   :  { %v2097_v41 = vpack.c.bf16 %v2093_v40, %v2093_v40  ;;  %v2099_v42 = vpack.c.bf16 %v2095_v46, %v2095_v46 }
 0x238   :  { %2395 = vmatprep.mubr.bf16.mxu0 %v2097_v41  ;;  %2435 = vmatprep.mubr.bf16.mxu1 %v2099_v42 }
 0x239   :  { %2396 = vmatmul.mubr.bf16.vlgmr.msra.gmra.mrb[4].mxu0 %v2096_v44  ;;  %2436 = vmatmul.mubr.bf16.vlgmr.msra.gmra.mrb[4].mxu1 %v2098_v53 }
 0x23a   :  { %3059 = vmatpush3.bf16.msra.mxu0 %v3569_v43  ;;  %3074 = vmatprep.mubr.msk.bf16.mxu0 %vm3736_vm0, %v3735_v14 }
 0x23b   :  { %3060 = vmatprep.subr.bf16.mxu0 %v3735_v14  ;;  %3094 = vmatprep.mubr.msk.bf16.mxu1 %vm3736_vm0, %v3735_v14 }
 0x23c   :  { %3079 = vmatpush3.bf16.msra.mxu1 %v3577_v13 }
 0x23d   :  { %3080 = vmatprep.subr.bf16.mxu1 %v3735_v14 }
 0x23e   :  { %3061 = vmatpush3.bf16.msra.mxu0 %v3570_v45 }
 0x23f   :  { %3062 = vmatprep.subr.bf16.mxu0 %v3735_v14 }
 0x240   :  { %3081 = vmatpush3.bf16.msra.mxu1 %v3578_v34 }
 0x241   :  { %3082 = vmatprep.subr.bf16.mxu1 %v3735_v14 }
 0x242   :  { %3063 = vmatpush3.bf16.msra.mxu0 %v3571_v47 }
 0x243   :  { %3064 = vmatprep.subr.bf16.mxu0 %v3735_v14 }
 0x244   :  { %3083 = vmatpush3.bf16.msra.mxu1 %v3579_v51 }
 0x245   :  { %3084 = vmatprep.subr.bf16.mxu1 %v3735_v14 }
 0x246   :  { %3065 = vmatpush3.bf16.msra.mxu0 %v3572_v36 }
 0x247   :  { %3066 = vmatprep.subr.bf16.mxu0 %v3735_v14 }
 0x248   :  { %3085 = vmatpush3.bf16.msra.mxu1 %v3580_v52 }
 0x249   :  { %3086 = vmatprep.subr.bf16.mxu1 %v3735_v14 }
 0x24a   :  { %3067 = vmatpush3.bf16.msra.mxu0 %v3573_v37 }
 0x24b   :  { %3068 = vmatprep.subr.bf16.mxu0 %v3735_v14 }
 0x24c   :  { %3087 = vmatpush3.bf16.msra.mxu1 %v3581_v54 }
 0x24d   :  { %3088 = vmatprep.subr.bf16.mxu1 %v3735_v14 }
 0x24e   :  { %3069 = vmatpush3.bf16.msra.mxu0 %v3574_v48 }
 0x24f   :  { %3070 = vmatprep.subr.bf16.mxu0 %v3735_v14 }
 0x250   :  { %3089 = vmatpush3.bf16.msra.mxu1 %v3582_v55 }
 0x251   :  { %3090 = vmatprep.subr.bf16.mxu1 %v3735_v14 }
 0x252   :  { %3071 = vmatpush3.bf16.msra.mxu0 %v3575_v49 }
 0x253   :  { %3072 = vmatprep.subr.bf16.mxu0 %v3735_v14 }
 0x254   :  { %3091 = vmatpush3.bf16.msra.mxu1 %v3583_v7 }
 0x255   :  { %3092 = vmatprep.subr.bf16.mxu1 %v3735_v14 }
 0x256   :  { %3073 = vmatpush3.bf16.msra.mxu0 %v3576_v50 }
 0x258   :  { %3093 = vmatpush3.bf16.msra.mxu1 %v3584_v8 }
 0x30c   :  { %v3012_v56 = vpop.f32.mrb[4].mxu0  ;;  %v3034_v57 = vpop.f32.mrb[4].mxu1 }
 0x30d   :  { %v3013_v59 = vpop.f32.mrb[5].mxu0  ;;  %v3035_v60 = vpop.f32.mrb[5].mxu1 }
 0x30e   :  { %v3014_v61 = vadd.f32 %v3013_v59, %v3012_v56  ;;  %v3036_v62 = vadd.f32 %v3035_v60, %v3034_v57  ;;  %v3015_v63 = vpop.f32.mrb[6].mxu0  ;;  %v3037_v0 = vpop.f32.mrb[6].mxu1 }
 0x30f   :  { %v3016_v1 = vpop.f32.mrb[7].mxu0  ;;  %v3038_v2 = vpop.f32.mrb[7].mxu1 }
 0x310   :  { %v2398_v3 = vadd.f32 %v3014_v61, %v2945_v58 }
 0x312   :  { %v2438_v4 = vadd.f32 %v3036_v62, %v2398_v3 }
 0x314   :  { %v2443_v5 = vmax.f32 %v2438_v4, 0.0 }
 0x316   :  { %v2444_v6 = vpack.c.bf16 %v2443_v5, %v2443_v5 }
 0x318   :  { %3075 = vmatmul.mubr.bf16.vlgmr.msra.gmra.mrb[8].mxu0 %v2444_v6 }
 0x3eb   :  { %v2550_v10 = vpop.f32.mrb[8].mxu0 }
 0x3ec   :  { %v2551_v11 = vadd.f32 %v2978_v9, %v2550_v10  ;;  %v3076_v15 = vpop.f32.mrb[9].mxu0 }
 0x3ed   :  { %v2553_v16 = vpop.f32.mrb[10].mxu0 }
 0x3ee   :  { %v2556_v17 = vmax.f32 %v2551_v11, 0.0  ;;  %v3077_v18 = vpop.f32.mrb[11].mxu0 }
 0x3f0   :  { %v2557_v19 = vpack.c.bf16 %v2556_v17, %v2556_v17 }
 0x3f2   :  { %3095 = vmatmul.mubr.bf16.vlgmr.msra.gmra.mrb[8].mxu1 %v2557_v19 }
 0x4c5   :  { %v2663_v21 = vpop.f32.mrb[8].mxu1 }
 0x4c6   :  { %v2664_v14 = vadd.f32 %v2987_v20, %v2663_v21  ;;  %v3096_v22 = vpop.f32.mrb[9].mxu1 }
 0x4c7   :  { %v2666_v23 = vpop.f32.mrb[10].mxu1 }
 0x4c8   :  { %2669 = vst [vmem:[#allocation11] sm:$0xff] %v2664_v14  ;;  %v3097_v24 = vpop.f32.mrb[11].mxu1 }
 0x4c9   :  { %2674 = vsyncadd [#allocation4], 96  ;;  %s3737_s6 = smov [#allocation11]  }
 0x4ca   :  { %s2675_s1 = sshll.u32 %s3737_s6, 4  ;;  %s2676_s1 = int_to_ptr.vmem [resolvable:$true] %s2675_s1 }
 0x4cb   :  { %s3695_s15 = scalar_lea.vmem %s2676_s1, 32  ;;  %s3699_s16 = scalar_lea.vmem %s2676_s1, 128 }
 0x4cc   :  { %p3696_p12 = scmp.ne.s32.totalorder %s2676_s1, %s3695_s15  ;;  %p3700_p13 = scmp.lt.s32.totalorder %s2676_s1, %s2676_s1 }
 0x4cd   :  { %p3701_p0 = scmp.lt.s32.totalorder %s3699_s16, %s3695_s15 }
 0x4cf   :  { %p3702_p1 = por %p3701_p0, %p3700_p13 }
 0x4d1   :  { %p3703_p2 = pnand %p3702_p1, %p3696_p12 }
 0x4d3   :  { %3706 = shalt.err (!%p3703_p2)
}
 0x4d4   :  { %s3707_s18 = scalar_lea.hbm %s3957_s9, 32 }
 0x4d5   :  { %p3708_p3 = scmp.ne.s32.totalorder %s3957_s9, %s3707_s18  ;;  %p3711_p4 = scmp.lt.u32.totalorder %s3707_s18, %s3957_s9 }
 0x4d7   :  { %p3713_p5 = pnand %p3711_p4, %p3708_p3 }
 0x4d9   :  { %3716 = shalt.err (!%p3713_p5)
}
 0x4da   :  { %s3738_s20 = smov 32   ;;  %s3739_s26 = smov 2  }
 0x4db   :  { %2681 = dma.vmem_to_hbm [thread:$0]  %s2676_s1, 32, %s3957_s9, [#allocation4], %s3738_s20, %s3738_s20, %s3739_s26  }
 0x4dc   :  { %3723 = dma.done.wait [#allocation4], 128  }
 0x4dd   :  { %3724 = vsyncadd [#allocation4], 4294967168 }
 0x4de   :  { %2685 = vsyncpa [#allocation3], 1 }
 0x4df   :  { %2686 = vsyncpa [#allocation6], 1 }
 0x4e0   :  { %2687 = vsyncpa [#allocation9], 1 }
 0x4e1   :  { %2688 = vsyncpa [#allocation4], 1 }

</bundles_post_ra>
